<compile_context>
chip_gen: v7x
topology: tpu7x:2x2x1
jax: 0.10.0
libtpu: 0.0.40
codegen_flags: <defaults>
</compile_context>

<pallas_src>
import jax
import jax.numpy as jnp
from jax.experimental import pallas as pl
from jax.experimental.pallas import tpu as pltpu

NEG_SLOPE = 0.01   # nn.LeakyReLU default
LANE = 128


def _leaky_relu(x):
    return jnp.where(x > 0, x, NEG_SLOPE * x)


def _round_up(x, m):
    return (x + m - 1) // m * m


# ----------------------------------------------------------------------------
# Kernel: one grid step = one batch tile (bt, S, Hp), rows flattened to
# (bt*S, Hp) so the MXU sees many rows per pass.  dis/pop broadcast over the
# batch dim inside the kernel.  (The reshape is layout-free when S % 8 == 0.)
# ----------------------------------------------------------------------------
def generator_kernel(x_ref, dis_ref, pop_ref, w1_ref, w2_ref, w4_ref, w5_ref,
                     w6_ref, o_ref, cov_ref):
    bt, s, h = x_ref.shape            # h == Hp (multiple of 128)
    rows = bt * s
    mdt = w1_ref.dtype                # matmul operand dtype (bf16 or f32)

    x = x_ref[...]                                       # f32 (bt, S, Hp)
    # element-wise work stays f32 (no bf16 VPU on v5e)
    za = _leaky_relu(dis_ref[...] * x).reshape(rows, h)
    zb = _leaky_relu(pop_ref[...] * x).reshape(rows, h)

    # Two H-wide branch matmuls written into the two column halves of one
    # (rows, 2H) scratch: exact replacement of the block-diag(W1,W2) fusion
    # with no zero-FLOPs, and it also deletes the concat copy while W4 is
    # still consumed whole.
    h1 = _leaky_relu(jnp.dot(za.astype(mdt), w1_ref[...],
                             preferred_element_type=jnp.float32))
    h2 = _leaky_relu(jnp.dot(zb.astype(mdt), w2_ref[...],
                             preferred_element_type=jnp.float32))
    cov_ref[:, :h] = h1.astype(cov_ref.dtype)
    cov_ref[:, h:] = h2.astype(cov_ref.dtype)

    f1 = _leaky_relu(jnp.dot(cov_ref[...], w4_ref[...],
                             preferred_element_type=jnp.float32))
    f2 = _leaky_relu(jnp.dot(f1.astype(mdt), w5_ref[...],
                             preferred_element_type=jnp.float32))
    out = jnp.maximum(jnp.dot(f2.astype(mdt), w6_ref[...],
                              preferred_element_type=jnp.float32), 0.0)

    o_ref[...] = out.reshape(bt, s, h).astype(o_ref.dtype)


# ----------------------------------------------------------------------------
# Padding helpers (lane-dense feature dim).
# ----------------------------------------------------------------------------
def _pad_last(a, new):
    pad = new - a.shape[-1]
    if pad == 0:
        return a
    cfg = [(0, 0)] * (a.ndim - 1) + [(0, pad)]
    return jnp.pad(a, cfg)


def _pad_square(w, hp, dtype):
    h = w.shape[0]
    w = jnp.asarray(w)
    if h == hp:
        return w.astype(dtype)
    return jnp.zeros((hp, hp), dtype).at[:h, :h].set(w.astype(dtype))


def _pad_w4(w4, h, hp, dtype):
    w4 = jnp.asarray(w4)
    if h == hp:
        return w4.astype(dtype)
    out = jnp.zeros((2 * hp, hp), dtype)
    out = out.at[:h, :h].set(w4[:h].astype(dtype))
    out = out.at[hp:hp + h, :h].set(w4[h:].astype(dtype))
    return out


# ----------------------------------------------------------------------------
# Wrapper
# ----------------------------------------------------------------------------
def generator_forward(new_x, dis, pop, params, *,
                      matmul_dtype=jnp.bfloat16,
                      vmem_budget_bytes=40 * 1024 * 1024):
    """new_x: (B, H, S); dis, pop: (S, H); params: dict with W1..W6.

    Returns (B, S, H) float32, matching the PyTorch forward (in f32).
    """
    B, H, S = new_x.shape
    f32 = jnp.float32
    mm_bpe = jnp.dtype(matmul_dtype).itemsize

    # ---- lane-dense feature dim: pad H up to a multiple of 128 -------------
    hp = _round_up(max(H, LANE), LANE)

    # (B,H,S) -> (B,S,Hp).  With allow_input_fusion (and an outer jax.jit)
    # this transpose/pad folds into the Pallas input DMA instead of a
    # standalone HBM round trip.
    x_t = _pad_last(jnp.transpose(new_x, (0, 2, 1)).astype(f32), hp)
    dis_p = _pad_last(jnp.asarray(dis, f32), hp)
    pop_p = _pad_last(jnp.asarray(pop, f32), hp)

    w1 = _pad_square(params["W1"], hp, matmul_dtype)
    w2 = _pad_square(params["W2"], hp, matmul_dtype)
    w4 = _pad_w4(params["W4"], H, hp, matmul_dtype)
    w5 = _pad_square(params["W5"], hp, matmul_dtype)
    w6 = _pad_square(params["W6"], hp, matmul_dtype)

    # ---- batch tile from an explicit VMEM budget (conservative for v7x) ----
    per_row = (4 * hp * 2 * 2        # x + out tiles, f32, double-buffered
               + 2 * hp * mm_bpe     # cov scratch row
               + 6 * hp * 4)         # headroom for live f32 intermediates
    invariant = 6 * hp * hp * mm_bpe + 2 * S * hp * 4   # weights + dis/pop
    avail = max(vmem_budget_bytes - 2 * invariant, 1 << 20)
    rows_target = int(max(S, min(2048, avail // per_row)))

    max_bt = max(1, rows_target // max(S, 1))
    if B >= 2:
        max_bt = min(max_bt, max(1, B // 2))   # grid >= 2: both v7x TCs busy
    max_bt = min(max_bt, B)

    bt = 1
    for d in range(1, max_bt + 1):             # largest divisor of B
        if B % d == 0:
            bt = d
    pad_b = 0
    if 2 * bt < max_bt:                        # divisor much worse -> pad B
        bt = max_bt
        pad_b = _round_up(B, bt) - B
        x_t = jnp.pad(x_t, ((0, pad_b), (0, 0), (0, 0)))
    bp = B + pad_b
    grid = (bp // bt,)
    rows = bt * S

    est_vmem = 2 * invariant + rows * per_row + (4 << 20)
    vmem_limit = (int(min(est_vmem, 60 * 1024 * 1024))
                  if est_vmem > (30 << 20) else None)

    def invariant_spec(shape, single_buffer):
        imap = lambda g: (0,) * len(shape)     # noqa: E731
        if single_buffer and hasattr(pl, "Buffered"):
            try:
                # grid-invariant block: a second pipeline buffer is pure waste
                return pl.BlockSpec(shape, imap, pipeline_mode=pl.Buffered(1))
            except TypeError:
                pass
        return pl.BlockSpec(shape, imap)

    def run(use_optional_features):
        in_specs = [
            pl.BlockSpec((bt, S, hp), lambda g: (g, 0, 0)),          # x (streamed)
            invariant_spec((S, hp), use_optional_features),          # dis
            invariant_spec((S, hp), use_optional_features),          # pop
            invariant_spec((hp, hp), use_optional_features),         # W1
            invariant_spec((hp, hp), use_optional_features),         # W2
            invariant_spec((2 * hp, hp), use_optional_features),     # W4
            invariant_spec((hp, hp), use_optional_features),         # W5
            invariant_spec((hp, hp), use_optional_features),         # W6
        ]
        cp_kwargs = dict(dimension_semantics=("parallel",))
        if vmem_limit is not None:
            cp_kwargs["vmem_limit_bytes"] = vmem_limit
        if use_optional_features:
            # let XLA fold the transpose/pad of x into the input DMA
            cp_kwargs["allow_input_fusion"] = [True] + [False] * 7
        return pl.pallas_call(
            generator_kernel,
            out_shape=jax.ShapeDtypeStruct((bp, S, hp), f32),
            grid_spec=pltpu.PrefetchScalarGridSpec(
                num_scalar_prefetch=0,
                grid=grid,
                in_specs=in_specs,
                out_specs=pl.BlockSpec((bt, S, hp), lambda g: (g, 0, 0)),
                scratch_shapes=[pltpu.VMEM((rows, 2 * hp), matmul_dtype)],
            ),
            compiler_params=pltpu.CompilerParams(**cp_kwargs),
        )(x_t, dis_p, pop_p, w1, w2, w4, w5, w6)

    try:
        out = run(True)
    except Exception:
        # Compatibility fallback: retry without the optional compiler knobs
        # (pipeline_mode single-buffering / allow_input_fusion) if this JAX
        # build rejects them.  Same math either way.
        out = run(False)

    if pad_b:
        out = out[:B]
    if hp != H:
        # TODO(synk): keep H a multiple of 128 in production so this
        # post-kernel slice (an extra HBM pass over the output) disappears.
        out = out[..., :H]
    return out


# ----------------------------------------------------------------------------
# Reference + demo
# ----------------------------------------------------------------------------
def xavier_normal(key, shape):
    fan_in, fan_out = shape[0], shape[1]
    std = (2.0 / (fan_in + fan_out)) ** 0.5
    return std * jax.random.normal(key, shape, dtype=jnp.float32)


def reference_forward(new_x, dis, pop, params):
    # Pure-JAX reference mirroring the PyTorch code (float32).
    x_t = jnp.transpose(new_x, (0, 2, 1)).astype(jnp.float32)
    h1 = _leaky_relu(_leaky_relu(dis * x_t) @ params["W1"])
    h2 = _leaky_relu(_leaky_relu(pop * x_t) @ params["W2"])
    cov = jnp.concatenate((h1, h2), axis=2)
    f1 = _leaky_relu(cov @ params["W4"])
    f2 = _leaky_relu(f1 @ params["W5"])
    return jnp.maximum(f2 @ params["W6"], 0.0)


def _make_case(key, B, Hd, S):
    ks = jax.random.split(key, 9)
    new_x = jax.random.normal(ks[0], (B, Hd, S), dtype=jnp.float32)
    dis = jax.random.uniform(ks[1], (S, Hd), dtype=jnp.float32)
    pop = jax.random.uniform(ks[2], (S, Hd), dtype=jnp.float32)
    params = {
        "W1": xavier_normal(ks[3], (Hd, Hd)),
        "W2": xavier_normal(ks[4], (Hd, Hd)),
        "W3": xavier_normal(ks[5], (Hd, Hd)),   # allocated but unused (as in PyTorch)
        "W4": xavier_normal(ks[6], (2 * Hd, Hd)),
        "W5": xavier_normal(ks[7], (Hd, Hd)),
        "W6": xavier_normal(ks[8], (Hd, Hd)),
    }
    return new_x, dis, pop, params


if __name__ == "__main__":
    key = jax.random.PRNGKey(0)
    k1, k2 = jax.random.split(key)

    # Case 1: toy module shapes (H_Dim1 == H_Dim2 is required by the original
    # shape algebra), f32 matmul operands -> strict check vs the reference.
    B, Hd, S = 2, 32, 8
    new_x, dis, pop, params = _make_case(k1, B, Hd, S)
    out = generator_forward(new_x, dis, pop, params, matmul_dtype=jnp.float32)
    jax.block_until_ready(out)
    ref = reference_forward(new_x, dis, pop, params)
    assert out.shape == (B, S, Hd)
    assert jnp.allclose(out, ref, atol=1e-4, rtol=1e-4), "f32 mismatch vs reference"

    # Case 2: lane-dense H, default bf16 matmul operands (v6e/v7x fast path),
    # looser tolerance vs the f32 reference.
    B2, Hd2, S2 = 4, 128, 8
    new_x2, dis2, pop2, params2 = _make_case(k2, B2, Hd2, S2)
    out2 = generator_forward(new_x2, dis2, pop2, params2)
    jax.block_until_ready(out2)
    ref2 = reference_forward(new_x2, dis2, pop2, params2)
    assert out2.shape == (B2, S2, Hd2)
    assert jnp.allclose(out2, ref2, atol=5e-2, rtol=5e-2), "bf16 mismatch vs reference"

    print("KERNEL_OK")
</pallas_src>

<mosaic_0001>
module attributes {stable_mosaic.version = 11 : i64} {
  func.func @generator_kernel(%arg0: i32, %arg1: memref<1x8x128xf32, #tpu.memory_space<vmem>>, %arg2: memref<8x128xf32, #tpu.memory_space<vmem>>, %arg3: memref<8x128xf32, #tpu.memory_space<vmem>>, %arg4: memref<128x128xf32, #tpu.memory_space<vmem>>, %arg5: memref<128x128xf32, #tpu.memory_space<vmem>>, %arg6: memref<256x128xf32, #tpu.memory_space<vmem>>, %arg7: memref<128x128xf32, #tpu.memory_space<vmem>>, %arg8: memref<128x128xf32, #tpu.memory_space<vmem>>, %arg9: memref<1x8x128xf32, #tpu.memory_space<vmem>>, %arg10: memref<8x256xf32, #tpu.memory_space<vmem>>) attributes {dimension_semantics = [#tpu.dimension_semantics<parallel>], iteration_bounds = array<i64: 2>, scalar_prefetch = 0 : i64, scratch_operands = 1 : i64, tpu.core_type = #tpu.core_type<tc>, window_params = [{transform_indices = @transform_0, window_bounds = array<i64: 1, 8, 128>}, {pipeline_mode = #tpu.pipeline_mode<synchronous>, transform_indices = @transform_1, window_bounds = array<i64: 8, 128>}, {pipeline_mode = #tpu.pipeline_mode<synchronous>, transform_indices = @transform_2, window_bounds = array<i64: 8, 128>}, {pipeline_mode = #tpu.pipeline_mode<synchronous>, transform_indices = @transform_3, window_bounds = array<i64: 128, 128>}, {pipeline_mode = #tpu.pipeline_mode<synchronous>, transform_indices = @transform_4, window_bounds = array<i64: 128, 128>}, {pipeline_mode = #tpu.pipeline_mode<synchronous>, transform_indices = @transform_5, window_bounds = array<i64: 256, 128>}, {pipeline_mode = #tpu.pipeline_mode<synchronous>, transform_indices = @transform_6, window_bounds = array<i64: 128, 128>}, {pipeline_mode = #tpu.pipeline_mode<synchronous>, transform_indices = @transform_7, window_bounds = array<i64: 128, 128>}, {transform_indices = @transform_8, window_bounds = array<i64: 1, 8, 128>}]} {
    %c0 = arith.constant 0 : index
    %c0_0 = arith.constant 0 : index
    %c0_1 = arith.constant 0 : index
    %0 = vector.load %arg1[%c0, %c0_0, %c0_1] : memref<1x8x128xf32, #tpu.memory_space<vmem>>, vector<1x8x128xf32>
    %c0_2 = arith.constant 0 : index
    %c0_3 = arith.constant 0 : index
    %1 = vector.load %arg2[%c0_2, %c0_3] : memref<8x128xf32, #tpu.memory_space<vmem>>, vector<8x128xf32>
    %2 = vector.shape_cast %1 : vector<8x128xf32> to vector<1x8x128xf32>
    %3 = arith.mulf %2, %0 : vector<1x8x128xf32>
    %cst = arith.constant 0.000000e+00 : f32
    %4 = vector.broadcast %cst : f32 to vector<1x8x128xf32>
    %5 = arith.cmpf ogt, %3, %4 : vector<1x8x128xf32>
    %cst_4 = arith.constant 0.00999999977 : f32
    %6 = vector.broadcast %cst_4 : f32 to vector<1x8x128xf32>
    %7 = arith.mulf %6, %3 : vector<1x8x128xf32>
    %8 = arith.select %5, %3, %7 : vector<1x8x128xi1>, vector<1x8x128xf32>
    %9 = vector.shape_cast %8 : vector<1x8x128xf32> to vector<8x128xf32>
    %c0_5 = arith.constant 0 : index
    %c0_6 = arith.constant 0 : index
    %10 = vector.load %arg3[%c0_5, %c0_6] : memref<8x128xf32, #tpu.memory_space<vmem>>, vector<8x128xf32>
    %11 = vector.shape_cast %10 : vector<8x128xf32> to vector<1x8x128xf32>
    %12 = arith.mulf %11, %0 : vector<1x8x128xf32>
    %cst_7 = arith.constant 0.000000e+00 : f32
    %13 = vector.broadcast %cst_7 : f32 to vector<1x8x128xf32>
    %14 = arith.cmpf ogt, %12, %13 : vector<1x8x128xf32>
    %cst_8 = arith.constant 0.00999999977 : f32
    %15 = vector.broadcast %cst_8 : f32 to vector<1x8x128xf32>
    %16 = arith.mulf %15, %12 : vector<1x8x128xf32>
    %17 = arith.select %14, %12, %16 : vector<1x8x128xi1>, vector<1x8x128xf32>
    %18 = vector.shape_cast %17 : vector<1x8x128xf32> to vector<8x128xf32>
    %c0_9 = arith.constant 0 : index
    %c0_10 = arith.constant 0 : index
    %19 = vector.load %arg4[%c0_9, %c0_10] : memref<128x128xf32, #tpu.memory_space<vmem>>, vector<128x128xf32>
    %cst_11 = arith.constant dense<0.000000e+00> : vector<8x128xf32>
    %20 = tpu.matmul %9, %19, %cst_11 {dimension_numbers = #tpu.dot_dimension_numbers<[1], [0], [0], [1], [0, 0, 1, 1], [], []>} : vector<8x128xf32>, vector<128x128xf32>, vector<8x128xf32> -> vector<8x128xf32>
    %cst_12 = arith.constant 0.000000e+00 : f32
    %21 = vector.broadcast %cst_12 : f32 to vector<8x128xf32>
    %22 = arith.cmpf ogt, %20, %21 : vector<8x128xf32>
    %cst_13 = arith.constant 0.00999999977 : f32
    %23 = vector.broadcast %cst_13 : f32 to vector<8x128xf32>
    %24 = arith.mulf %23, %20 : vector<8x128xf32>
    %25 = arith.select %22, %20, %24 : vector<8x128xi1>, vector<8x128xf32>
    %c0_14 = arith.constant 0 : index
    %c0_15 = arith.constant 0 : index
    %26 = vector.load %arg5[%c0_14, %c0_15] : memref<128x128xf32, #tpu.memory_space<vmem>>, vector<128x128xf32>
    %cst_16 = arith.constant dense<0.000000e+00> : vector<8x128xf32>
    %27 = tpu.matmul %18, %26, %cst_16 {dimension_numbers = #tpu.dot_dimension_numbers<[1], [0], [0], [1], [0, 0, 1, 1], [], []>} : vector<8x128xf32>, vector<128x128xf32>, vector<8x128xf32> -> vector<8x128xf32>
    %cst_17 = arith.constant 0.000000e+00 : f32
    %28 = vector.broadcast %cst_17 : f32 to vector<8x128xf32>
    %29 = arith.cmpf ogt, %27, %28 : vector<8x128xf32>
    %cst_18 = arith.constant 0.00999999977 : f32
    %30 = vector.broadcast %cst_18 : f32 to vector<8x128xf32>
    %31 = arith.mulf %30, %27 : vector<8x128xf32>
    %32 = arith.select %29, %27, %31 : vector<8x128xi1>, vector<8x128xf32>
    %c0_19 = arith.constant 0 : index
    %c0_20 = arith.constant 0 : index
    %33 = vector.load %arg10[%c0_19, %c0_20] : memref<8x256xf32, #tpu.memory_space<vmem>>, vector<8x128xf32>
    tpu.vector_store %arg10[%c0_19, %c0_20], %25 {strides = array<i32>} : memref<8x256xf32, #tpu.memory_space<vmem>>, vector<8x128xf32>,
    %c0_21 = arith.constant 0 : index
    %c128 = arith.constant 128 : index
    %34 = vector.load %arg10[%c0_21, %c128] : memref<8x256xf32, #tpu.memory_space<vmem>>, vector<8x128xf32>
    tpu.vector_store %arg10[%c0_21, %c128], %32 {strides = array<i32>} : memref<8x256xf32, #tpu.memory_space<vmem>>, vector<8x128xf32>,
    %c0_22 = arith.constant 0 : index
    %c0_23 = arith.constant 0 : index
    %35 = vector.load %arg10[%c0_22, %c0_23] : memref<8x256xf32, #tpu.memory_space<vmem>>, vector<8x256xf32>
    %c0_24 = arith.constant 0 : index
    %c0_25 = arith.constant 0 : index
    %36 = vector.load %arg6[%c0_24, %c0_25] : memref<256x128xf32, #tpu.memory_space<vmem>>, vector<256x128xf32>
    %cst_26 = arith.constant dense<0.000000e+00> : vector<8x128xf32>
    %37 = tpu.matmul %35, %36, %cst_26 {dimension_numbers = #tpu.dot_dimension_numbers<[1], [0], [0], [1], [0, 0, 1, 1], [], []>} : vector<8x256xf32>, vector<256x128xf32>, vector<8x128xf32> -> vector<8x128xf32>
    %cst_27 = arith.constant 0.000000e+00 : f32
    %38 = vector.broadcast %cst_27 : f32 to vector<8x128xf32>
    %39 = arith.cmpf ogt, %37, %38 : vector<8x128xf32>
    %cst_28 = arith.constant 0.00999999977 : f32
    %40 = vector.broadcast %cst_28 : f32 to vector<8x128xf32>
    %41 = arith.mulf %40, %37 : vector<8x128xf32>
    %42 = arith.select %39, %37, %41 : vector<8x128xi1>, vector<8x128xf32>
    %c0_29 = arith.constant 0 : index
    %c0_30 = arith.constant 0 : index
    %43 = vector.load %arg7[%c0_29, %c0_30] : memref<128x128xf32, #tpu.memory_space<vmem>>, vector<128x128xf32>
    %cst_31 = arith.constant dense<0.000000e+00> : vector<8x128xf32>
    %44 = tpu.matmul %42, %43, %cst_31 {dimension_numbers = #tpu.dot_dimension_numbers<[1], [0], [0], [1], [0, 0, 1, 1], [], []>} : vector<8x128xf32>, vector<128x128xf32>, vector<8x128xf32> -> vector<8x128xf32>
    %cst_32 = arith.constant 0.000000e+00 : f32
    %45 = vector.broadcast %cst_32 : f32 to vector<8x128xf32>
    %46 = arith.cmpf ogt, %44, %45 : vector<8x128xf32>
    %cst_33 = arith.constant 0.00999999977 : f32
    %47 = vector.broadcast %cst_33 : f32 to vector<8x128xf32>
    %48 = arith.mulf %47, %44 : vector<8x128xf32>
    %49 = arith.select %46, %44, %48 : vector<8x128xi1>, vector<8x128xf32>
    %c0_34 = arith.constant 0 : index
    %c0_35 = arith.constant 0 : index
    %50 = vector.load %arg8[%c0_34, %c0_35] : memref<128x128xf32, #tpu.memory_space<vmem>>, vector<128x128xf32>
    %cst_36 = arith.constant dense<0.000000e+00> : vector<8x128xf32>
    %51 = tpu.matmul %49, %50, %cst_36 {dimension_numbers = #tpu.dot_dimension_numbers<[1], [0], [0], [1], [0, 0, 1, 1], [], []>} : vector<8x128xf32>, vector<128x128xf32>, vector<8x128xf32> -> vector<8x128xf32>
    %cst_37 = arith.constant 0.000000e+00 : f32
    %52 = vector.broadcast %cst_37 : f32 to vector<8x128xf32>
    %53 = arith.maximumf %51, %52 : vector<8x128xf32>
    %54 = vector.shape_cast %53 : vector<8x128xf32> to vector<1x8x128xf32>
    %c0_38 = arith.constant 0 : index
    %c0_39 = arith.constant 0 : index
    %c0_40 = arith.constant 0 : index
    %55 = vector.load %arg9[%c0_38, %c0_39, %c0_40] : memref<1x8x128xf32, #tpu.memory_space<vmem>>, vector<1x8x128xf32>
    tpu.vector_store %arg9[%c0_38, %c0_39, %c0_40], %54 {strides = array<i32>} : memref<1x8x128xf32, #tpu.memory_space<vmem>>, vector<1x8x128xf32>,
    return
  }
  func.func @transform_0(%arg0: i32) -> (i32, i32, i32) {
    %c0_i32 = arith.constant 0 : i32
    %c0_i32_0 = arith.constant 0 : i32
    %c0_i32_1 = arith.constant 0 : i32
    return %arg0, %c0_i32, %c0_i32_0 : i32, i32, i32
  }
  func.func @transform_1(%arg0: i32) -> (i32, i32) {
    %c0_i32 = arith.constant 0 : i32
    %c0_i32_0 = arith.constant 0 : i32
    %c0_i32_1 = arith.constant 0 : i32
    return %c0_i32, %c0_i32_0 : i32, i32
  }
  func.func @transform_2(%arg0: i32) -> (i32, i32) {
    %c0_i32 = arith.constant 0 : i32
    %c0_i32_0 = arith.constant 0 : i32
    %c0_i32_1 = arith.constant 0 : i32
    return %c0_i32, %c0_i32_0 : i32, i32
  }
  func.func @transform_3(%arg0: i32) -> (i32, i32) {
    %c0_i32 = arith.constant 0 : i32
    %c0_i32_0 = arith.constant 0 : i32
    %c0_i32_1 = arith.constant 0 : i32
    return %c0_i32, %c0_i32_0 : i32, i32
  }
  func.func @transform_4(%arg0: i32) -> (i32, i32) {
    %c0_i32 = arith.constant 0 : i32
    %c0_i32_0 = arith.constant 0 : i32
    %c0_i32_1 = arith.constant 0 : i32
    return %c0_i32, %c0_i32_0 : i32, i32
  }
  func.func @transform_5(%arg0: i32) -> (i32, i32) {
    %c0_i32 = arith.constant 0 : i32
    %c0_i32_0 = arith.constant 0 : i32
    %c0_i32_1 = arith.constant 0 : i32
    return %c0_i32, %c0_i32_0 : i32, i32
  }
  func.func @transform_6(%arg0: i32) -> (i32, i32) {
    %c0_i32 = arith.constant 0 : i32
    %c0_i32_0 = arith.constant 0 : i32
    %c0_i32_1 = arith.constant 0 : i32
    return %c0_i32, %c0_i32_0 : i32, i32
  }
  func.func @transform_7(%arg0: i32) -> (i32, i32) {
    %c0_i32 = arith.constant 0 : i32
    %c0_i32_0 = arith.constant 0 : i32
    %c0_i32_1 = arith.constant 0 : i32
    return %c0_i32, %c0_i32_0 : i32, i32
  }
  func.func @transform_8(%arg0: i32) -> (i32, i32, i32) {
    %c0_i32 = arith.constant 0 : i32
    %c0_i32_0 = arith.constant 0 : i32
    %c0_i32_1 = arith.constant 0 : i32
    return %arg0, %c0_i32, %c0_i32_0 : i32, i32, i32
  }
}

module attributes {stable_mosaic.version = 11 : i64} {
  func.func @generator_kernel(%arg0: i32, %arg1: memref<1x8x128xf32, #tpu.memory_space<vmem>>, %arg2: memref<8x128xf32, #tpu.memory_space<vmem>>, %arg3: memref<8x128xf32, #tpu.memory_space<vmem>>, %arg4: memref<128x128xf32, #tpu.memory_space<vmem>>, %arg5: memref<128x128xf32, #tpu.memory_space<vmem>>, %arg6: memref<256x128xf32, #tpu.memory_space<vmem>>, %arg7: memref<128x128xf32, #tpu.memory_space<vmem>>, %arg8: memref<128x128xf32, #tpu.memory_space<vmem>>, %arg9: memref<1x8x128xf32, #tpu.memory_space<vmem>>, %arg10: memref<8x256xf32, #tpu.memory_space<vmem>>) attributes {dimension_semantics = [#tpu.dimension_semantics<parallel>], iteration_bounds = array<i64: 2>, scalar_prefetch = 0 : i64, scratch_operands = 1 : i64, tpu.core_type = #tpu.core_type<tc>, window_params = [{transform_indices = @transform_0, window_bounds = array<i64: 1, 8, 128>}, {pipeline_mode = #tpu.pipeline_mode<synchronous>, transform_indices = @transform_1, window_bounds = array<i64: 8, 128>}, {pipeline_mode = #tpu.pipeline_mode<synchronous>, transform_indices = @transform_2, window_bounds = array<i64: 8, 128>}, {pipeline_mode = #tpu.pipeline_mode<synchronous>, transform_indices = @transform_3, window_bounds = array<i64: 128, 128>}, {pipeline_mode = #tpu.pipeline_mode<synchronous>, transform_indices = @transform_4, window_bounds = array<i64: 128, 128>}, {pipeline_mode = #tpu.pipeline_mode<synchronous>, transform_indices = @transform_5, window_bounds = array<i64: 256, 128>}, {pipeline_mode = #tpu.pipeline_mode<synchronous>, transform_indices = @transform_6, window_bounds = array<i64: 128, 128>}, {pipeline_mode = #tpu.pipeline_mode<synchronous>, transform_indices = @transform_7, window_bounds = array<i64: 128, 128>}, {transform_indices = @transform_8, window_bounds = array<i64: 1, 8, 128>}]} {
    %c0 = arith.constant 0 : index
    %c0_0 = arith.constant 0 : index
    %c0_1 = arith.constant 0 : index
    %0 = vector.load %arg1[%c0, %c0_0, %c0_1] : memref<1x8x128xf32, #tpu.memory_space<vmem>>, vector<1x8x128xf32>
    %c0_2 = arith.constant 0 : index
    %c0_3 = arith.constant 0 : index
    %1 = vector.load %arg2[%c0_2, %c0_3] : memref<8x128xf32, #tpu.memory_space<vmem>>, vector<8x128xf32>
    %2 = vector.shape_cast %1 : vector<8x128xf32> to vector<1x8x128xf32>
    %3 = arith.mulf %2, %0 : vector<1x8x128xf32>
    %cst = arith.constant 0.000000e+00 : f32
    %4 = vector.broadcast %cst : f32 to vector<1x8x128xf32>
    %5 = arith.cmpf ogt, %3, %4 : vector<1x8x128xf32>
    %cst_4 = arith.constant 0.00999999977 : f32
    %6 = vector.broadcast %cst_4 : f32 to vector<1x8x128xf32>
    %7 = arith.mulf %6, %3 : vector<1x8x128xf32>
    %8 = arith.select %5, %3, %7 : vector<1x8x128xi1>, vector<1x8x128xf32>
    %9 = vector.shape_cast %8 : vector<1x8x128xf32> to vector<8x128xf32>
    %c0_5 = arith.constant 0 : index
    %c0_6 = arith.constant 0 : index
    %10 = vector.load %arg3[%c0_5, %c0_6] : memref<8x128xf32, #tpu.memory_space<vmem>>, vector<8x128xf32>
    %11 = vector.shape_cast %10 : vector<8x128xf32> to vector<1x8x128xf32>
    %12 = arith.mulf %11, %0 : vector<1x8x128xf32>
    %cst_7 = arith.constant 0.000000e+00 : f32
    %13 = vector.broadcast %cst_7 : f32 to vector<1x8x128xf32>
    %14 = arith.cmpf ogt, %12, %13 : vector<1x8x128xf32>
    %cst_8 = arith.constant 0.00999999977 : f32
    %15 = vector.broadcast %cst_8 : f32 to vector<1x8x128xf32>
    %16 = arith.mulf %15, %12 : vector<1x8x128xf32>
    %17 = arith.select %14, %12, %16 : vector<1x8x128xi1>, vector<1x8x128xf32>
    %18 = vector.shape_cast %17 : vector<1x8x128xf32> to vector<8x128xf32>
    %c0_9 = arith.constant 0 : index
    %c0_10 = arith.constant 0 : index
    %19 = vector.load %arg4[%c0_9, %c0_10] : memref<128x128xf32, #tpu.memory_space<vmem>>, vector<128x128xf32>
    %cst_11 = arith.constant dense<0.000000e+00> : vector<8x128xf32>
    %20 = tpu.matmul %9, %19, %cst_11 {dimension_numbers = #tpu.dot_dimension_numbers<[1], [0], [0], [1], [0, 0, 1, 1], [], []>} : vector<8x128xf32>, vector<128x128xf32>, vector<8x128xf32> -> vector<8x128xf32>
    %cst_12 = arith.constant 0.000000e+00 : f32
    %21 = vector.broadcast %cst_12 : f32 to vector<8x128xf32>
    %22 = arith.cmpf ogt, %20, %21 : vector<8x128xf32>
    %cst_13 = arith.constant 0.00999999977 : f32
    %23 = vector.broadcast %cst_13 : f32 to vector<8x128xf32>
    %24 = arith.mulf %23, %20 : vector<8x128xf32>
    %25 = arith.select %22, %20, %24 : vector<8x128xi1>, vector<8x128xf32>
    %c0_14 = arith.constant 0 : index
    %c0_15 = arith.constant 0 : index
    %26 = vector.load %arg5[%c0_14, %c0_15] : memref<128x128xf32, #tpu.memory_space<vmem>>, vector<128x128xf32>
    %cst_16 = arith.constant dense<0.000000e+00> : vector<8x128xf32>
    %27 = tpu.matmul %18, %26, %cst_16 {dimension_numbers = #tpu.dot_dimension_numbers<[1], [0], [0], [1], [0, 0, 1, 1], [], []>} : vector<8x128xf32>, vector<128x128xf32>, vector<8x128xf32> -> vector<8x128xf32>
    %cst_17 = arith.constant 0.000000e+00 : f32
    %28 = vector.broadcast %cst_17 : f32 to vector<8x128xf32>
    %29 = arith.cmpf ogt, %27, %28 : vector<8x128xf32>
    %cst_18 = arith.constant 0.00999999977 : f32
    %30 = vector.broadcast %cst_18 : f32 to vector<8x128xf32>
    %31 = arith.mulf %30, %27 : vector<8x128xf32>
    %32 = arith.select %29, %27, %31 : vector<8x128xi1>, vector<8x128xf32>
    %c0_19 = arith.constant 0 : index
    %c0_20 = arith.constant 0 : index
    %33 = vector.load %arg10[%c0_19, %c0_20] : memref<8x256xf32, #tpu.memory_space<vmem>>, vector<8x128xf32>
    tpu.vector_store %arg10[%c0_19, %c0_20], %25 {strides = array<i32>} : memref<8x256xf32, #tpu.memory_space<vmem>>, vector<8x128xf32>,
    %c0_21 = arith.constant 0 : index
    %c128 = arith.constant 128 : index
    %34 = vector.load %arg10[%c0_21, %c128] : memref<8x256xf32, #tpu.memory_space<vmem>>, vector<8x128xf32>
    tpu.vector_store %arg10[%c0_21, %c128], %32 {strides = array<i32>} : memref<8x256xf32, #tpu.memory_space<vmem>>, vector<8x128xf32>,
    %c0_22 = arith.constant 0 : index
    %c0_23 = arith.constant 0 : index
    %35 = vector.load %arg10[%c0_22, %c0_23] : memref<8x256xf32, #tpu.memory_space<vmem>>, vector<8x256xf32>
    %c0_24 = arith.constant 0 : index
    %c0_25 = arith.constant 0 : index
    %36 = vector.load %arg6[%c0_24, %c0_25] : memref<256x128xf32, #tpu.memory_space<vmem>>, vector<256x128xf32>
    %cst_26 = arith.constant dense<0.000000e+00> : vector<8x128xf32>
    %37 = tpu.matmul %35, %36, %cst_26 {dimension_numbers = #tpu.dot_dimension_numbers<[1], [0], [0], [1], [0, 0, 1, 1], [], []>} : vector<8x256xf32>, vector<256x128xf32>, vector<8x128xf32> -> vector<8x128xf32>
    %cst_27 = arith.constant 0.000000e+00 : f32
    %38 = vector.broadcast %cst_27 : f32 to vector<8x128xf32>
    %39 = arith.cmpf ogt, %37, %38 : vector<8x128xf32>
    %cst_28 = arith.constant 0.00999999977 : f32
    %40 = vector.broadcast %cst_28 : f32 to vector<8x128xf32>
    %41 = arith.mulf %40, %37 : vector<8x128xf32>
    %42 = arith.select %39, %37, %41 : vector<8x128xi1>, vector<8x128xf32>
    %c0_29 = arith.constant 0 : index
    %c0_30 = arith.constant 0 : index
    %43 = vector.load %arg7[%c0_29, %c0_30] : memref<128x128xf32, #tpu.memory_space<vmem>>, vector<128x128xf32>
    %cst_31 = arith.constant dense<0.000000e+00> : vector<8x128xf32>
    %44 = tpu.matmul %42, %43, %cst_31 {dimension_numbers = #tpu.dot_dimension_numbers<[1], [0], [0], [1], [0, 0, 1, 1], [], []>} : vector<8x128xf32>, vector<128x128xf32>, vector<8x128xf32> -> vector<8x128xf32>
    %cst_32 = arith.constant 0.000000e+00 : f32
    %45 = vector.broadcast %cst_32 : f32 to vector<8x128xf32>
    %46 = arith.cmpf ogt, %44, %45 : vector<8x128xf32>
    %cst_33 = arith.constant 0.00999999977 : f32
    %47 = vector.broadcast %cst_33 : f32 to vector<8x128xf32>
    %48 = arith.mulf %47, %44 : vector<8x128xf32>
    %49 = arith.select %46, %44, %48 : vector<8x128xi1>, vector<8x128xf32>
    %c0_34 = arith.constant 0 : index
    %c0_35 = arith.constant 0 : index
    %50 = vector.load %arg8[%c0_34, %c0_35] : memref<128x128xf32, #tpu.memory_space<vmem>>, vector<128x128xf32>
    %cst_36 = arith.constant dense<0.000000e+00> : vector<8x128xf32>
    %51 = tpu.matmul %49, %50, %cst_36 {dimension_numbers = #tpu.dot_dimension_numbers<[1], [0], [0], [1], [0, 0, 1, 1], [], []>} : vector<8x128xf32>, vector<128x128xf32>, vector<8x128xf32> -> vector<8x128xf32>
    %cst_37 = arith.constant 0.000000e+00 : f32
    %52 = vector.broadcast %cst_37 : f32 to vector<8x128xf32>
    %53 = arith.maximumf %51, %52 : vector<8x128xf32>
    %54 = vector.shape_cast %53 : vector<8x128xf32> to vector<1x8x128xf32>
    %c0_38 = arith.constant 0 : index
    %c0_39 = arith.constant 0 : index
    %c0_40 = arith.constant 0 : index
    %55 = vector.load %arg9[%c0_38, %c0_39, %c0_40] : memref<1x8x128xf32, #tpu.memory_space<vmem>>, vector<1x8x128xf32>
    tpu.vector_store %arg9[%c0_38, %c0_39, %c0_40], %54 {strides = array<i32>} : memref<1x8x128xf32, #tpu.memory_space<vmem>>, vector<1x8x128xf32>,
    return
  }
  func.func @transform_0(%arg0: i32) -> (i32, i32, i32) {
    %c0_i32 = arith.constant 0 : i32
    %c0_i32_0 = arith.constant 0 : i32
    %c0_i32_1 = arith.constant 0 : i32
    return %arg0, %c0_i32, %c0_i32_0 : i32, i32, i32
  }
  func.func @transform_1(%arg0: i32) -> (i32, i32) {
    %c0_i32 = arith.constant 0 : i32
    %c0_i32_0 = arith.constant 0 : i32
    %c0_i32_1 = arith.constant 0 : i32
    return %c0_i32, %c0_i32_0 : i32, i32
  }
  func.func @transform_2(%arg0: i32) -> (i32, i32) {
    %c0_i32 = arith.constant 0 : i32
    %c0_i32_0 = arith.constant 0 : i32
    %c0_i32_1 = arith.constant 0 : i32
    return %c0_i32, %c0_i32_0 : i32, i32
  }
  func.func @transform_3(%arg0: i32) -> (i32, i32) {
    %c0_i32 = arith.constant 0 : i32
    %c0_i32_0 = arith.constant 0 : i32
    %c0_i32_1 = arith.constant 0 : i32
    return %c0_i32, %c0_i32_0 : i32, i32
  }
  func.func @transform_4(%arg0: i32) -> (i32, i32) {
    %c0_i32 = arith.constant 0 : i32
    %c0_i32_0 = arith.constant 0 : i32
    %c0_i32_1 = arith.constant 0 : i32
    return %c0_i32, %c0_i32_0 : i32, i32
  }
  func.func @transform_5(%arg0: i32) -> (i32, i32) {
    %c0_i32 = arith.constant 0 : i32
    %c0_i32_0 = arith.constant 0 : i32
    %c0_i32_1 = arith.constant 0 : i32
    return %c0_i32, %c0_i32_0 : i32, i32
  }
  func.func @transform_6(%arg0: i32) -> (i32, i32) {
    %c0_i32 = arith.constant 0 : i32
    %c0_i32_0 = arith.constant 0 : i32
    %c0_i32_1 = arith.constant 0 : i32
    return %c0_i32, %c0_i32_0 : i32, i32
  }
  func.func @transform_7(%arg0: i32) -> (i32, i32) {
    %c0_i32 = arith.constant 0 : i32
    %c0_i32_0 = arith.constant 0 : i32
    %c0_i32_1 = arith.constant 0 : i32
    return %c0_i32, %c0_i32_0 : i32, i32
  }
  func.func @transform_8(%arg0: i32) -> (i32, i32, i32) {
    %c0_i32 = arith.constant 0 : i32
    %c0_i32_0 = arith.constant 0 : i32
    %c0_i32_1 = arith.constant 0 : i32
    return %arg0, %c0_i32, %c0_i32_0 : i32, i32, i32
  }
}

</mosaic_0001>

<bundles_post_ra>
// kernel: tpu_custom_call.1
= control target key start
LH: loop header
LB: loop body
LE: loop exit
PB: predicated region body
PF: predicated region fallthrough
CT: control target
= control target key end

     0   :  { %s2324_s0 = inlined_call_operand.hbm [shape: f32[2,8,128], index: 0, kind: input, shape index: {}]   ;;  %s2325_s1 = inlined_call_operand.hbm [shape: f32[8,128], index: 1, kind: input, shape index: {}]   ;;  %s2326_s2 = inlined_call_operand.hbm [shape: f32[8,128], index: 2, kind: input, shape index: {}]   ;;  %s2327_s3 = inlined_call_operand.hbm [shape: f32[128,128], index: 3, kind: input, shape index: {}]   ;;  %s2328_s4 = inlined_call_operand.hbm [shape: f32[128,128], index: 4, kind: input, shape index: {}]   ;;  %s2329_s5 = inlined_call_operand.hbm [shape: f32[256,128], index: 5, kind: input, shape index: {}]   ;;  %s2330_s6 = inlined_call_operand.hbm [shape: f32[128,128], index: 6, kind: input, shape index: {}]   ;;  %s2331_s7 = inlined_call_operand.hbm [shape: f32[128,128], index: 7, kind: input, shape index: {}]   ;;  %s2332_s8 = inlined_call_operand.hbm [shape: f32[2,8,128], index: 8, kind: output, shape index: {}]  }
   0x1   :  { %2336 = sst [smem:[#allocation24_spill]] %s2325_s1 }
   0x2   :  { %13 = vsyncpa [#allocation4], 0 }
   0x3   :  { %15 = vsyncpa [#allocation4 + $0x1], 0 }
   0x4   :  { %16 = vsyncpa [#allocation7], 0 }
   0x5   :  { %17 = vsyncpa [#allocation10], 0 }
   0x6   :  { %18 = vsyncpa [#allocation13], 0 }
   0x7   :  { %19 = vsyncpa [#allocation16], 0 }
   0x8   :  { %20 = vsyncpa [#allocation5], 0 }
   0x9   :  { %22 = vsyncpa [#allocation5 + $0x1], 0  ;;  %s1933_s27 = smov 0   ;;  %s1935_s28 = smov 0  }
   0xa   :  { %s1937_s29 = smov 0   ;;  %s1939_s30 = smov 0  }
   0xb LB: > { %s1874_s9 = smov [#allocation6]   ;;  %s1954_s11 = sadd.s32 4294967295, %s1872_s30   ;;  %s1872_s30 = sphi %s1939_s30, %s2361_s30   ;;  %s1868_s29 = sphi %s1937_s29, %s2360_s29   ;;  %s1864_s28 = sphi %s1935_s28, %s2359_s28   ;;  %s1860_s27 = sphi %s1933_s27, %s2358_s27  }
   0xc   : > { %s245_s10 = sshll.u32 %s1874_s9, 4  ;;  %p1046_p0 = scmp.ge.s32.totalorder %s1872_s30, 1  ;;  %s246_s10 = int_to_ptr.vmem [resolvable:$true] %s245_s10 }
   0xd   : > { %p2333_p1 = scmp.eq.s32.totalorder %s1954_s11, 0  ;;  %p232_p2 = scmp.lt.s32.totalorder %s1872_s30, 3 }
   0xe   : > { %s1875_s13 = smov [#allocation9]   ;;  %s1876_s16 = smov [#allocation12]  }
   0xf   : > { %p1959_p3 = pnand %p1046_p0, %p232_p2  ;;  %s266_s14 = sshll.u32 %s1875_s13, 4  ;;  %s1966_s14 = int_to_ptr.vmem [resolvable:$true] %s266_s14 }
  0x10   : > { %s292_s17 = sshll.u32 %s1876_s16, 4  ;;  %s2339_s1 = sld [smem:[#allocation24_spill]]  ;;  %s1974_s17 = int_to_ptr.vmem [resolvable:$true] %s292_s17 }
  0x11   : > { %s2337_s12 = scalar_select %p1959_p3, 1, 0 }
  0x12   : > { %p1474_p5 = pneg %p1959_p3 }
  0x14   : > { %p1970_p6 = pnand %p1474_p5, %p2333_p1 }
  0x16   : > { %s1564_s20 = scalar_lea.hbm %s2339_s1, 128  ;;  %p1984_p8 = pneg %p1970_p6 }
  0x17   : > { %p1565_p7 = scmp.ne.s32.totalorder %s2339_s1, %s1564_s20  ;;  %p1571_p11 = scmp.lt.u32.totalorder %s1564_s20, %s2339_s1 }
  0x19   : > { %p1567_p9 = pnand %p1984_p8, %p1565_p7 }
  0x1b   : > { %p1568_p10 = pneg %p1567_p9 }
  0x1d   : > { %p1573_p12 = pnand %p1571_p11, %p1568_p10 }
  0x1f   : > { %1576 = shalt.err (!%p1573_p12)
}
  0x20   : > { %s1577_s26 = scalar_lea.vmem %s246_s10, 128  ;;  %p1585_p5 = scmp.lt.s32.totalorder %s246_s10, %s246_s10 }
  0x21   : > { %p1578_p13 = scmp.ne.s32.totalorder %s246_s10, %s1577_s26  ;;  %p1586_p4 = scmp.lt.s32.totalorder %s1577_s26, %s1577_s26 }
  0x23   : > { %p1580_p0 = pnand %p1578_p13, %p1984_p8  ;;  %p1587_p1 = por %p1586_p4, %p1585_p5 }
  0x25   : > { %p1581_p2 = pneg %p1580_p0 }
  0x27   : > { %p1588_p3 = pnand %p1587_p1, %p1581_p2 }
  0x29   : > { %1591 = shalt.err (!%p1588_p3)
}
  0x2a   : > { %1477 = dma.hbm_to_vmem [thread:$0]  (!%p1970_p6), %s2339_s1, 128, %s246_s10, [#allocation7]  }
  0x2b   : > { %s1592_s19 = scalar_lea.hbm %s2327_s3, 2048 }
  0x2c   : > { %p1593_p7 = scmp.ne.s32.totalorder %s2327_s3, %s1592_s19  ;;  %p1599_p1 = scmp.lt.u32.totalorder %s1592_s19, %s2327_s3 }
  0x2e   : > { %p1595_p9 = pnand %p1593_p7, %p1984_p8 }
  0x30   : > { %p1596_p4 = pneg %p1595_p9 }
  0x32   : > { %p1601_p3 = pnand %p1599_p1, %p1596_p4 }
  0x34   : > { %1604 = shalt.err (!%p1601_p3)
}
  0x35   : > { %s1605_s10 = scalar_lea.vmem %s1966_s14, 2048  ;;  %p1613_p13 = scmp.lt.s32.totalorder %s1966_s14, %s1966_s14 }
  0x36   : > { %p1606_p10 = scmp.ne.s32.totalorder %s1966_s14, %s1605_s10  ;;  %p1614_p0 = scmp.lt.s32.totalorder %s1605_s10, %s1605_s10 }
  0x38   : > { %p1608_p11 = pnand %p1606_p10, %p1984_p8  ;;  %p1615_p2 = por %p1614_p0, %p1613_p13 }
  0x3a   : > { %p1609_p12 = pneg %p1608_p11 }
  0x3c   : > { %p1616_p5 = pnand %p1615_p2, %p1609_p12 }
  0x3e   : > { %1619 = shalt.err (!%p1616_p5)
}
  0x3f   : > { %s1877_s25 = smov 128   ;;  %s1878_s26 = smov 8  }
  0x40   : > { %1483 = dma.hbm_to_vmem [thread:$0]  (!%p1970_p6), %s2327_s3, 2048, %s1966_s14, [#allocation10], %s1877_s25, %s1877_s25, %s1878_s26  }
  0x41   : > { %s1620_s19 = scalar_lea.hbm %s2329_s5, 4096 }
  0x42   : > { %p1621_p7 = scmp.ne.s32.totalorder %s2329_s5, %s1620_s19  ;;  %p1627_p1 = scmp.lt.u32.totalorder %s1620_s19, %s2329_s5 }
  0x44   : > { %p1623_p9 = pnand %p1621_p7, %p1984_p8 }
  0x46   : > { %p1624_p4 = pneg %p1623_p9 }
  0x48   : > { %p1629_p3 = pnand %p1627_p1, %p1624_p4 }
  0x4a   : > { %1632 = shalt.err (!%p1629_p3)
}
  0x4b   : > { %s1633_s14 = scalar_lea.vmem %s1974_s17, 4096  ;;  %p1641_p13 = scmp.lt.s32.totalorder %s1974_s17, %s1974_s17 }
  0x4c   : > { %p1634_p10 = scmp.ne.s32.totalorder %s1974_s17, %s1633_s14  ;;  %p1642_p0 = scmp.lt.s32.totalorder %s1633_s14, %s1633_s14 }
  0x4e   : > { %p1636_p11 = pnand %p1634_p10, %p1984_p8  ;;  %p1643_p2 = por %p1642_p0, %p1641_p13 }
  0x50   : > { %p1637_p12 = pneg %p1636_p11 }
  0x52   : > { %p1644_p5 = pnand %p1643_p2, %p1637_p12 }
  0x54   : > { %1647 = shalt.err (!%p1644_p5)
}
  0x55   : > { %1489 = dma.hbm_to_vmem [thread:$0]  (!%p1970_p6), %s2329_s5, 4096, %s1974_s17, [#allocation13], %s1877_s25, %s1877_s25, %s1878_s26  }
  0x56   : > { %s1879_s13 = smov [#allocation8]   ;;  %s1880_s18 = smov [#allocation11]  }
  0x57   : > { %s256_s16 = sshll.u32 %s1879_s13, 4  ;;  %s279_s19 = sshll.u32 %s1880_s18, 4  ;;  %s257_s16 = int_to_ptr.vmem [resolvable:$true] %s256_s16  ;;  %s280_s19 = int_to_ptr.vmem [resolvable:$true] %s279_s19 }
  0x58   : > { %s1648_s22 = scalar_lea.hbm %s2326_s2, 128 }
  0x59   : > { %p1649_p7 = scmp.ne.s32.totalorder %s2326_s2, %s1648_s22  ;;  %p1655_p1 = scmp.lt.u32.totalorder %s1648_s22, %s2326_s2 }
  0x5b   : > { %p1651_p9 = pnand %p1649_p7, %p1984_p8 }
  0x5d   : > { %p1652_p4 = pneg %p1651_p9 }
  0x5f   : > { %p1657_p3 = pnand %p1655_p1, %p1652_p4 }
  0x61   : > { %1660 = shalt.err (!%p1657_p3)
}
  0x62   : > { %s1661_s17 = scalar_lea.vmem %s257_s16, 128  ;;  %p1669_p13 = scmp.lt.s32.totalorder %s257_s16, %s257_s16 }
  0x63   : > { %p1662_p10 = scmp.ne.s32.totalorder %s257_s16, %s1661_s17  ;;  %p1670_p0 = scmp.lt.s32.totalorder %s1661_s17, %s1661_s17 }
  0x65   : > { %p1664_p11 = pnand %p1662_p10, %p1984_p8  ;;  %p1671_p2 = por %p1670_p0, %p1669_p13 }
  0x67   : > { %p1665_p12 = pneg %p1664_p11 }
  0x69   : > { %p1672_p5 = pnand %p1671_p2, %p1665_p12 }
  0x6b   : > { %1675 = shalt.err (!%p1672_p5)
}
  0x6c   : > { %1480 = dma.hbm_to_vmem [thread:$0]  (!%p1970_p6), %s2326_s2, 128, %s257_s16, [#allocation7]  }
  0x6d   : > { %s1676_s20 = scalar_lea.hbm %s2328_s4, 2048 }
  0x6e   : > { %p1677_p7 = scmp.ne.s32.totalorder %s2328_s4, %s1676_s20  ;;  %p1683_p1 = scmp.lt.u32.totalorder %s1676_s20, %s2328_s4 }
  0x70   : > { %p1679_p9 = pnand %p1677_p7, %p1984_p8 }
  0x72   : > { %p1680_p4 = pneg %p1679_p9 }
  0x74   : > { %p1685_p3 = pnand %p1683_p1, %p1680_p4 }
  0x76   : > { %1688 = shalt.err (!%p1685_p3)
}
  0x77   : > { %s1689_s10 = scalar_lea.vmem %s280_s19, 2048  ;;  %p1697_p13 = scmp.lt.s32.totalorder %s280_s19, %s280_s19 }
  0x78   : > { %p1690_p10 = scmp.ne.s32.totalorder %s280_s19, %s1689_s10  ;;  %p1698_p0 = scmp.lt.s32.totalorder %s1689_s10, %s1689_s10 }
  0x7a   : > { %p1692_p11 = pnand %p1690_p10, %p1984_p8  ;;  %p1699_p2 = por %p1698_p0, %p1697_p13 }
  0x7c   : > { %p1693_p12 = pneg %p1692_p11 }
  0x7e   : > { %p1700_p5 = pnand %p1699_p2, %p1693_p12 }
  0x80   : > { %1703 = shalt.err (!%p1700_p5)
}
  0x81   : > { %1486 = dma.hbm_to_vmem [thread:$0]  (!%p1970_p6), %s2328_s4, 2048, %s280_s19, [#allocation10], %s1877_s25, %s1877_s25, %s1878_s26  }
  0x82   : > { %s1881_s9 = smov [#allocation14]   ;;  %s1882_s1 = smov [#allocation15]  }
  0x83   : > { %s305_s13 = sshll.u32 %s1881_s9, 4  ;;  %s318_s18 = sshll.u32 %s1882_s1, 4  ;;  %s306_s13 = int_to_ptr.vmem [resolvable:$true] %s305_s13  ;;  %s319_s18 = int_to_ptr.vmem [resolvable:$true] %s318_s18 }
  0x84   : > { %s1704_s22 = scalar_lea.hbm %s2330_s6, 2048 }
  0x85   : > { %p1705_p7 = scmp.ne.s32.totalorder %s2330_s6, %s1704_s22  ;;  %p1711_p1 = scmp.lt.u32.totalorder %s1704_s22, %s2330_s6 }
  0x87   : > { %p1707_p9 = pnand %p1705_p7, %p1984_p8 }
  0x89   : > { %p1708_p4 = pneg %p1707_p9 }
  0x8b   : > { %p1713_p3 = pnand %p1711_p1, %p1708_p4 }
  0x8d   : > { %1716 = shalt.err (!%p1713_p3)
}
  0x8e   : > { %s1717_s19 = scalar_lea.vmem %s306_s13, 2048  ;;  %p1725_p13 = scmp.lt.s32.totalorder %s306_s13, %s306_s13 }
  0x8f   : > { %p1718_p10 = scmp.ne.s32.totalorder %s306_s13, %s1717_s19  ;;  %p1726_p0 = scmp.lt.s32.totalorder %s1717_s19, %s1717_s19 }
  0x91   : > { %p1720_p11 = pnand %p1718_p10, %p1984_p8  ;;  %p1727_p2 = por %p1726_p0, %p1725_p13 }
  0x93   : > { %p1721_p12 = pneg %p1720_p11 }
  0x95   : > { %p1728_p5 = pnand %p1727_p2, %p1721_p12 }
  0x97   : > { %1731 = shalt.err (!%p1728_p5)
}
  0x98   : > { %1492 = dma.hbm_to_vmem [thread:$0]  (!%p1970_p6), %s2330_s6, 2048, %s306_s13, [#allocation13], %s1877_s25, %s1877_s25, %s1878_s26  }
  0x99   : > { %s1732_s21 = scalar_lea.hbm %s2331_s7, 2048 }
  0x9a   : > { %p1733_p7 = scmp.ne.s32.totalorder %s2331_s7, %s1732_s21  ;;  %p1739_p1 = scmp.lt.u32.totalorder %s1732_s21, %s2331_s7 }
  0x9c   : > { %p1735_p9 = pnand %p1733_p7, %p1984_p8 }
  0x9e   : > { %p1736_p4 = pneg %p1735_p9 }
  0xa0   : > { %p1741_p3 = pnand %p1739_p1, %p1736_p4 }
  0xa2   : > { %1744 = shalt.err (!%p1741_p3)
}
  0xa3   : > { %s1745_s16 = scalar_lea.vmem %s319_s18, 2048  ;;  %p1753_p13 = scmp.lt.s32.totalorder %s319_s18, %s319_s18 }
  0xa4   : > { %p1746_p10 = scmp.ne.s32.totalorder %s319_s18, %s1745_s16  ;;  %p1754_p0 = scmp.lt.s32.totalorder %s1745_s16, %s1745_s16 }
  0xa6   : > { %p1748_p11 = pnand %p1746_p10, %p1984_p8  ;;  %p1755_p2 = por %p1754_p0, %p1753_p13 }
  0xa8   : > { %p1749_p12 = pneg %p1748_p11 }
  0xaa   : > { %p1756_p5 = pnand %p1755_p2, %p1749_p12 }
  0xac   : > { %1759 = shalt.err (!%p1756_p5)
}
  0xad   : > { %1495 = dma.hbm_to_vmem [thread:$0]  (!%p1970_p6), %s2331_s7, 2048, %s319_s18, [#allocation16], %s1877_s25, %s1877_s25, %s1878_s26  }
  0xae   : > { %s1045_s15 = sadd.s32 4294967294, %s1872_s30   ;;  %s2135_s23 = sadd.s32 1, %s1872_s30  }
  0xaf   : > { %s35_s17 = sadd.s32 1, %s1868_s29  ;;  %s32_s9 = ssub.s32 %s1872_s30, %s2135_s23 }
  0xb0   : > { %p42_p8 = scmp.ne.s32.totalorder %s1868_s29, %s1864_s28  ;;  %p33_p7 = scmp.eq.s32.totalorder %s32_s9, 0 }
  0xb1   : > { %p43_p9 = scmp.eq.s32.totalorder %s1872_s30, 0  ;;  %p48_p4 = scmp.ne.s32.totalorder %s1864_s28, %s1860_s27 }
  0xb2   : > { %p219_p1 = scmp.eq.s32.totalorder %s1954_s11, 1  ;;  %p2341_p10 = scmp.eq.s32.totalorder %s1954_s11, 0 }
  0xb3   : > { %s2147_s1 = scalar_select %p33_p7, %s1868_s29, %s35_s17  }
  0xb4   : > { %p44_p3 = por %p43_p9, %p42_p8  ;;  %p2151_p11 = por %p2341_p10, %p48_p4 }
  0xb5   : > { %p2155_p6 = por %p219_p1, %p42_p8  ;;  %p225_p12 = scmp.eq.s32.totalorder %s1045_s15, 1 }
  0xb6   : > { %p1511_p13 = scmp.lt.s32.totalorder %s1872_s30, 2  ;;  %s332_s26 = sand.u32 1, %s1868_s29  }
  0xb7   : > { %s2343_s25 = scalar_select %p2155_p6, 1, 0 }
  0xb8   : > { %p2161_p0 = por %p225_p12, %p48_p4  ;;  %s1055_s21 = sshll.u32 %s332_s26, 3 }
  0xb9   : > { %s1056_s22 = sshll.u32 %s1872_s30, 7  ;;  %s336_s16 = scalar_lea.vmem [#allocation3], %s1055_s21 }
  0xba   : > { %s2344_s18 = scalar_select %p2161_p0, 1, 0 }
  0xbb   : > { %s2169_s10 = scalar_lea.hbm %s2324_s0, %s1056_s22  ;;  %s343_s13 = sshll.u32 %s336_s16, 4  ;;  %s2175_s13 = int_to_ptr.vmem [resolvable:$true] %s343_s13 }
  0xbc   : > { %p2171_p2 = pnand %p1511_p13, %p44_p3  ;;  %s333_s15 = scalar_lea.sflag [#allocation4], %s332_s26 }
  0xbd   : > { %s1760_s17 = scalar_lea.hbm %s2169_s10, 128  ;;  %s1765_s22 = scalar_lea.hbm %s2324_s0, 256 }
  0xbe   : > { %p1761_p5 = scmp.ne.s32.totalorder %s2169_s10, %s1760_s17  ;;  %p1762_p8 = pneg %p2171_p2 }
  0xbf   : > { %p1766_p4 = scmp.lt.u32.totalorder %s2169_s10, %s2324_s0  ;;  %p1767_p1 = scmp.lt.u32.totalorder %s1765_s22, %s1760_s17 }
  0xc0   : > { %p1763_p7 = pnand %p1762_p8, %p1761_p5  ;;  %p1769_p10 = scmp.lt.u32.totalorder %s1760_s17, %s2169_s10 }
  0xc1   : > { %p1768_p3 = por %p1767_p1, %p1766_p4 }
  0xc2   : > { %p1764_p9 = pneg %p1763_p7 }
  0xc3   : > { %p1770_p12 = por %p1769_p10, %p1768_p3 }
  0xc5   : > { %p1771_p13 = pnand %p1770_p12, %p1764_p9 }
  0xc7   : > { %1774 = shalt.err (!%p1771_p13)
}
  0xc8   : > { %s1775_s26 = scalar_lea.vmem %s2175_s13, 128  ;;  %s1883_s16 = smov [#allocation3]  }
  0xc9   : > { %p1776_p5 = scmp.ne.s32.totalorder %s2175_s13, %s1775_s26  ;;  %s1780_s9 = sshll.u32 %s1883_s16, 4  ;;  %s1781_s9 = int_to_ptr.vmem [resolvable:$false] %s1780_s9 }
  0xca   : > { %s1782_s21 = scalar_lea.vmem %s1781_s9, 256  ;;  %p1783_p6 = scmp.lt.s32.totalorder %s2175_s13, %s1781_s9 }
  0xcb   : > { %p1778_p7 = pnand %p1776_p5, %p1762_p8  ;;  %p1784_p4 = scmp.lt.s32.totalorder %s1782_s21, %s1775_s26 }
  0xcd   : > { %p1779_p0 = pneg %p1778_p7  ;;  %p1785_p1 = por %p1784_p4, %p1783_p6 }
  0xcf   : > { %p1786_p3 = pnand %p1785_p1, %p1779_p0 }
  0xd1   : > { %1789 = shalt.err (!%p1786_p3)
}
  0xd2   : > { %1499 = dma.hbm_to_vmem [thread:$0]  (!%p2171_p2), %s2169_s10, 128, %s2175_s13, %s333_s15  }
  0xd3   : > { %p2346_p9 = scmp.ne.s32.totalorder %s2337_s12, 0 }
  0xd4   : > { %s2205_s17 = sand.u32 (!%p2346_p9), 1, %s1864_s28  }
  0xd5   : > { %352 = sbr.rel (%p2346_p9) target bundleno = 1147 (0x47b), region = 52  ;;  %s1058_s22 = sshll.u32 (!%p2346_p9), %s2205_s17, 3 }
  0xd6   : > { %s355_s24 = scalar_lea.sflag (!%p2346_p9), [#allocation4], %s2205_s17  ;;  %s2211_s14 = scalar_lea.vmem (!%p2346_p9), [#allocation3], %s1058_s22 }
  0xdc   : > { %1835 = dma.done.wait (%p2151_p11), %s355_s24, 128  }
  0xdd   : > { %1837 = vsyncadd (%p2151_p11), %s355_s24, 4294967168  ;;  %p2347_p6 = scmp.eq.s32.totalorder %s1954_s11, 0 }
  0xdf   : > { %1839 = dma.done.wait (%p2347_p6), [#allocation7], 256   ;;  %p2348_p0 = pmov %p2347_p6 }
  0xe1   : > { %1841 = vsyncadd (%p2348_p0), [#allocation7], 4294967040  ;;  %p2349_p2 = pmov %p2348_p0 }
  0xe2   : > { %p2350_p8 = pmov %p2348_p0 }
  0xe3   : > { %1843 = dma.done.wait (%p2349_p2), [#allocation10], 4096  }
  0xe4   : > { %1845 = vsyncadd (%p2350_p8), [#allocation10], 4294963200  ;;  %p2351_p10 = pmov %p2348_p0 }
  0xe5   : > { %p2352_p12 = pmov %p2348_p0 }
  0xe6   : > { %1847 = dma.done.wait (%p2351_p10), [#allocation13], 6144  }
  0xe7   : > { %1849 = vsyncadd (%p2352_p12), [#allocation13], 4294961152  ;;  %p2353_p11 = pmov %p2348_p0 }
  0xe8   : > { %p2354_p13 = pmov %p2348_p0 }
  0xe9   : > { %1851 = dma.done.wait (%p2353_p11), [#allocation16], 2048  }
  0xea   : > { %1853 = vsyncadd (%p2354_p13), [#allocation16], 4294965248  ;;  %v1884_v0 = vmov 0.0|0.0   ;;  %vm1885_vm0 = vmmov 0   ;;  %v1886_v1 = vmov 0.0   ;;  %v430_v2 = vld [vmem:[#allocation9] sm:$0xff] }
  0xeb   : > { %1314 = vmatprep.subr.bf16.mxu0 %v1884_v0  ;;  %1338 = vmatprep.subr.bf16.mxu1 %v1884_v0  ;;  %v431_v3 = vld [vmem:[#allocation9 + $0x8] sm:$0xff]  ;;  %v519_v4 = vld [vmem:[#allocation11] sm:$0xff]  ;;  %v432_v7 = vld [vmem:[#allocation9 + $0x10] sm:$0xff]  ;;  %s1068_s12 = sshll.u32 %s1954_s11, 7  ;;  %s418_s20 = scalar_lea.vmem [#allocation17], %s1058_s22 }
  0xec   : > { %1206 = vmatprep.mubr.msk.f32.mxu0 %vm1885_vm0, %v1886_v1  ;;  %1241 = vmatprep.mubr.msk.f32.mxu1 %vm1885_vm0, %v1886_v1  ;;  %v1315_v5 = vpack.c.bf16 %v431_v3, %v430_v2  ;;  %v520_v6 = vld [vmem:[#allocation11 + $0x8] sm:$0xff]  ;;  %v433_v8 = vld [vmem:[#allocation9 + $0x18] sm:$0xff]  ;;  %v521_v10 = vld [vmem:[#allocation11 + $0x10] sm:$0xff]  ;;  %s908_s10 = sshll.u32 %s418_s20, 4  ;;  %s2280_s15 = scalar_lea.hbm %s2332_s8, %s1068_s12  ;;  %s2282_s10 = int_to_ptr.vmem [resolvable:$true] %s908_s10 }
  0xed   : > { %v1339_v9 = vpack.c.bf16 %v520_v6, %v519_v4  ;;  %v522_v11 = vld [vmem:[#allocation11 + $0x18] sm:$0xff]  ;;  %v1318_v12 = vpack.c.bf16 %v433_v8, %v432_v7  ;;  %v434_v14 = vld [vmem:[#allocation9 + $0x20] sm:$0xff]  ;;  %v435_v15 = vld [vmem:[#allocation9 + $0x28] sm:$0xff]  ;;  %s895_s26 = scalar_lea.sflag [#allocation5], %s2205_s17  ;;  %s1790_s16 = scalar_lea.vmem %s2282_s10, 128 }
  0xee   : > { %1316 = vmatpush3.bf16.msra.mxu0 %v1315_v5  ;;  %v1342_v13 = vpack.c.bf16 %v522_v11, %v521_v10  ;;  %v523_v16 = vld [vmem:[#allocation11 + $0x20] sm:$0xff]  ;;  %v524_v17 = vld [vmem:[#allocation11 + $0x28] sm:$0xff]  ;;  %v1321_v18 = vpack.c.bf16 %v435_v15, %v434_v14  ;;  %v436_v20 = vld [vmem:[#allocation9 + $0x30] sm:$0xff]  ;;  %p1791_p5 = scmp.ne.s32.totalorder %s2282_s10, %s1790_s16  ;;  %p2355_p7 = scmp.ne.s32.totalorder %s2343_s25, 0 }
  0xef   : > { %1340 = vmatpush3.bf16.msra.mxu1 %v1339_v9  ;;  %1317 = vmatprep.subr.bf16.mxu0 %v1884_v0  ;;  %v1345_v19 = vpack.c.bf16 %v524_v17, %v523_v16  ;;  %v437_v21 = vld [vmem:[#allocation9 + $0x38] sm:$0xff]  ;;  %v525_v22 = vld [vmem:[#allocation11 + $0x30] sm:$0xff]  ;;  %v438_v26 = vld [vmem:[#allocation9 + $0x40] sm:$0xff]  ;;  %s1887_s11 = smov [#allocation17]  }
  0xf0   : > { %1341 = vmatprep.subr.bf16.mxu1 %v1884_v0  ;;  %v526_v23 = vld [vmem:[#allocation11 + $0x38] sm:$0xff]  ;;  %v1324_v24 = vpack.c.bf16 %v437_v21, %v436_v20  ;;  %v439_v27 = vld [vmem:[#allocation9 + $0x48] sm:$0xff]  ;;  %v527_v28 = vld [vmem:[#allocation11 + $0x40] sm:$0xff]  ;;  %p1792_p4 = pnand %p1791_p5, %p2355_p7  ;;  %s1794_s9 = sshll.u32 %s1887_s11, 4  ;;  %s1795_s9 = int_to_ptr.vmem [resolvable:$false] %s1794_s9 }
  0xf1   : > { %v1348_v25 = vpack.c.bf16 %v526_v23, %v525_v22  ;;  %v528_v29 = vld [vmem:[#allocation11 + $0x48] sm:$0xff]  ;;  %v1327_v30 = vpack.c.bf16 %v439_v27, %v438_v26  ;;  %v440_v32 = vld [vmem:[#allocation9 + $0x50] sm:$0xff]  ;;  %v441_v33 = vld [vmem:[#allocation9 + $0x58] sm:$0xff]  ;;  %s1796_s21 = scalar_lea.vmem %s1795_s9, 256  ;;  %p1797_p3 = scmp.lt.s32.totalorder %s2282_s10, %s1795_s9 }
  0xf2   : > { %1319 = vmatpush3.bf16.msra.mxu0 %v1318_v12  ;;  %v1351_v31 = vpack.c.bf16 %v528_v29, %v527_v28  ;;  %v529_v34 = vld [vmem:[#allocation11 + $0x50] sm:$0xff]  ;;  %v530_v35 = vld [vmem:[#allocation11 + $0x58] sm:$0xff]  ;;  %v1330_v36 = vpack.c.bf16 %v441_v33, %v440_v32  ;;  %v442_v37 = vld [vmem:[#allocation9 + $0x60] sm:$0xff]  ;;  %p1793_p1 = pneg %p1792_p4  ;;  %p1798_p9 = scmp.lt.s32.totalorder %s1796_s21, %s1790_s16 }
  0xf3   : > { %1343 = vmatpush3.bf16.msra.mxu1 %v1342_v13  ;;  %1320 = vmatprep.subr.bf16.mxu0 %v1884_v0  ;;  %v1354_v38 = vpack.c.bf16 %v530_v35, %v529_v34  ;;  %v443_v39 = vld [vmem:[#allocation9 + $0x68] sm:$0xff]  ;;  %v420_v41 = vld [vmem:[#allocation6] sm:$0xff]  ;;  %v531_v42 = vld [vmem:[#allocation11 + $0x60] sm:$0xff] }
  0xf4   : > { %1344 = vmatprep.subr.bf16.mxu1 %v1884_v0  ;;  %v419_v40 = vld [vmem:[%s2211_s14] sm:$0xff]  ;;  %v425_v44 = vld [vmem:[#allocation8] sm:$0xff]  ;;  %v1333_v45 = vpack.c.bf16 %v443_v39, %v442_v37  ;;  %v444_v48 = vld [vmem:[#allocation9 + $0x70] sm:$0xff]  ;;  %p1799_p6 = por %p1798_p9, %p1797_p3 }
  0xf5   : > { %v532_v43 = vld [vmem:[#allocation11 + $0x68] sm:$0xff]  ;;  %v421_v46 = vmul.f32 %v420_v41, %v419_v40  ;;  %v445_v49 = vld [vmem:[#allocation9 + $0x78] sm:$0xff]  ;;  %v533_v50 = vld [vmem:[#allocation11 + $0x70] sm:$0xff]  ;;  %v426_v51 = vmul.f32 %v425_v44, %v419_v40 }
  0xf6   : > { %1322 = vmatpush3.bf16.msra.mxu0 %v1321_v18  ;;  %v1357_v47 = vpack.c.bf16 %v532_v43, %v531_v42  ;;  %v534_v52 = vld [vmem:[#allocation11 + $0x78] sm:$0xff]  ;;  %v628_v53 = vld [vmem:[#allocation12 + $0x80] sm:$0xff]  ;;  %v629_v54 = vld [vmem:[#allocation12 + $0x88] sm:$0xff]  ;;  %v1336_v55 = vpack.c.bf16 %v445_v49, %v444_v48  ;;  %p1800_p0 = pnand %p1799_p6, %p1793_p1 }
  0xf7   : > { %1346 = vmatpush3.bf16.msra.mxu1 %v1345_v19  ;;  %1323 = vmatprep.subr.bf16.mxu0 %v1884_v0  ;;  %v423_v56 = vmul.f32 0.01, %v421_v46  ;;  %v1360_v57 = vpack.c.bf16 %v534_v52, %v533_v50  ;;  %vm422_vm1 = vcmp.gt.f32.partialorder %v421_v46, 0.0  ;;  %v428_v58 = vmul.f32 0.01, %v426_v51  ;;  %v612_v60 = vld [vmem:[#allocation12] sm:$0xff] }
  0xf8   : > { %1347 = vmatprep.subr.bf16.mxu1 %v1884_v0  ;;  %v1362_v59 = vpack.c.bf16 %v629_v54, %v628_v53  ;;  %v613_v61 = vld [vmem:[#allocation12 + $0x8] sm:$0xff]  ;;  %vm427_vm2 = vcmp.gt.f32.partialorder %v426_v51, 0.0  ;;  %v630_v62 = vld [vmem:[#allocation12 + $0x90] sm:$0xff]  ;;  %v631_v63 = vld [vmem:[#allocation12 + $0x98] sm:$0xff] }
  0xf9   : > { %v424_v2 = vsel %vm422_vm1, %v421_v46, %v423_v56  ;;  %v1364_v3 = vpack.c.bf16 %v613_v61, %v612_v60  ;;  %v429_v4 = vsel %vm427_vm2, %v426_v51, %v428_v58  ;;  %v1366_v5 = vpack.c.bf16 %v631_v63, %v630_v62  ;;  %v614_v6 = vld [vmem:[#allocation12 + $0x10] sm:$0xff]  ;;  %v615_v7 = vld [vmem:[#allocation12 + $0x18] sm:$0xff]  ;;  %v632_v8 = vld [vmem:[#allocation12 + $0xa0] sm:$0xff] }
  0xfa   : > { %1325 = vmatpush3.bf16.msra.mxu0 %v1324_v24  ;;  %v633_v9 = vld [vmem:[#allocation12 + $0xa8] sm:$0xff]  ;;  %v1368_v10 = vpack.c.bf16 %v615_v7, %v614_v6  ;;  %v616_v12 = vld [vmem:[#allocation12 + $0x20] sm:$0xff]  ;;  %v634_v14 = vld [vmem:[#allocation12 + $0xb0] sm:$0xff] }
  0xfb   : > { %1349 = vmatpush3.bf16.msra.mxu1 %v1348_v25  ;;  %1326 = vmatprep.subr.bf16.mxu0 %v1884_v0  ;;  %v1370_v11 = vpack.c.bf16 %v633_v9, %v632_v8  ;;  %v617_v13 = vld [vmem:[#allocation12 + $0x28] sm:$0xff]  ;;  %v635_v15 = vld [vmem:[#allocation12 + $0xb8] sm:$0xff]  ;;  %v618_v18 = vld [vmem:[#allocation12 + $0x30] sm:$0xff] }
  0xfc   : > { %1350 = vmatprep.subr.bf16.mxu1 %v1884_v0  ;;  %v1372_v16 = vpack.c.bf16 %v617_v13, %v616_v12  ;;  %v1374_v17 = vpack.c.bf16 %v635_v15, %v634_v14  ;;  %v619_v19 = vld [vmem:[#allocation12 + $0x38] sm:$0xff]  ;;  %v636_v20 = vld [vmem:[#allocation12 + $0xc0] sm:$0xff]  ;;  %v637_v21 = vld [vmem:[#allocation12 + $0xc8] sm:$0xff] }
  0xfd   : > { %v1376_v22 = vpack.c.bf16 %v619_v19, %v618_v18  ;;  %v1378_v23 = vpack.c.bf16 %v637_v21, %v636_v20  ;;  %v620_v24 = vld [vmem:[#allocation12 + $0x40] sm:$0xff]  ;;  %v621_v25 = vld [vmem:[#allocation12 + $0x48] sm:$0xff]  ;;  %v638_v26 = vld [vmem:[#allocation12 + $0xd0] sm:$0xff] }
  0xfe   : > { %1328 = vmatpush3.bf16.msra.mxu0 %v1327_v30  ;;  %v639_v27 = vld [vmem:[#allocation12 + $0xd8] sm:$0xff]  ;;  %v1380_v28 = vpack.c.bf16 %v621_v25, %v620_v24  ;;  %v622_v30 = vld [vmem:[#allocation12 + $0x50] sm:$0xff]  ;;  %v640_v32 = vld [vmem:[#allocation12 + $0xe0] sm:$0xff] }
  0xff   : > { %1352 = vmatpush3.bf16.msra.mxu1 %v1351_v31  ;;  %1329 = vmatprep.subr.bf16.mxu0 %v1884_v0  ;;  %v1382_v29 = vpack.c.bf16 %v639_v27, %v638_v26  ;;  %v623_v31 = vld [vmem:[#allocation12 + $0x58] sm:$0xff]  ;;  %v641_v33 = vld [vmem:[#allocation12 + $0xe8] sm:$0xff]  ;;  %v642_v39 = vld [vmem:[#allocation12 + $0xf0] sm:$0xff] }
 0x100   : > { %1353 = vmatprep.subr.bf16.mxu1 %v1884_v0  ;;  %v1384_v34 = vpack.c.bf16 %v623_v31, %v622_v30  ;;  %v1386_v35 = vpack.c.bf16 %v641_v33, %v640_v32  ;;  %v625_v37 = vld [vmem:[#allocation12 + $0x68] sm:$0xff]  ;;  %v643_v40 = vld [vmem:[#allocation12 + $0xf8] sm:$0xff]  ;;  %v626_v42 = vld [vmem:[#allocation12 + $0x70] sm:$0xff] }
 0x101   : > { %v1390_v41 = vpack.c.bf16 %v643_v40, %v642_v39  ;;  %v627_v43 = vld [vmem:[#allocation12 + $0x78] sm:$0xff]  ;;  %v718_v46 = vld [vmem:[#allocation14 + $0x8] sm:$0xff]  ;;  %v721_v51 = vld [vmem:[#allocation14 + $0x20] sm:$0xff] }
 0x102   : > { %1331 = vmatpush3.bf16.msra.mxu0 %v1330_v36  ;;  %v624_v36 = vld [vmem:[#allocation12 + $0x60] sm:$0xff]  ;;  %v1392_v44 = vpack.c.bf16 %v627_v43, %v626_v42  ;;  %v720_v49 = vld [vmem:[#allocation14 + $0x18] sm:$0xff]  ;;  %v722_v52 = vld [vmem:[#allocation14 + $0x28] sm:$0xff] }
 0x103   : > { %1355 = vmatpush3.bf16.msra.mxu1 %v1354_v38  ;;  %1332 = vmatprep.subr.bf16.mxu0 %v1884_v0  ;;  %v1388_v38 = vpack.c.bf16 %v625_v37, %v624_v36  ;;  %v1401_v53 = vpack.c.bf16 %v722_v52, %v721_v51  ;;  %v723_v54 = vld [vmem:[#allocation14 + $0x30] sm:$0xff]  ;;  %v726_v58 = vld [vmem:[#allocation14 + $0x48] sm:$0xff]  ;;  %v728_v61 = vld [vmem:[#allocation14 + $0x58] sm:$0xff] }
 0x104   : > { %1356 = vmatprep.subr.bf16.mxu1 %v1884_v0  ;;  %v727_v60 = vld [vmem:[#allocation14 + $0x50] sm:$0xff]  ;;  %v729_v9 = vld [vmem:[#allocation14 + $0x60] sm:$0xff]  ;;  %v732_v13 = vld [vmem:[#allocation14 + $0x78] sm:$0xff] }
 0x105   : > { %v1410_v62 = vpack.c.bf16 %v728_v61, %v727_v60  ;;  %v731_v12 = vld [vmem:[#allocation14 + $0x70] sm:$0xff]  ;;  %v806_v15 = vld [vmem:[#allocation15] sm:$0xff]  ;;  %v809_v19 = vld [vmem:[#allocation15 + $0x18] sm:$0xff] }
 0x106   : > { %1334 = vmatpush3.bf16.msra.mxu0 %v1333_v45  ;;  %v717_v45 = vld [vmem:[#allocation14] sm:$0xff]  ;;  %v1416_v14 = vpack.c.bf16 %v732_v13, %v731_v12  ;;  %v811_v21 = vld [vmem:[#allocation15 + $0x28] sm:$0xff]  ;;  %v813_v24 = vld [vmem:[#allocation15 + $0x38] sm:$0xff] }
 0x107   : > { %1358 = vmatpush3.bf16.msra.mxu1 %v1357_v47  ;;  %1335 = vmatprep.subr.bf16.mxu0 %v1884_v0  ;;  %v719_v47 = vld [vmem:[#allocation14 + $0x10] sm:$0xff]  ;;  %v1395_v48 = vpack.c.bf16 %v718_v46, %v717_v45  ;;  %v814_v26 = vld [vmem:[#allocation15 + $0x40] sm:$0xff]  ;;  %v815_v27 = vld [vmem:[#allocation15 + $0x48] sm:$0xff] }
 0x108   : > { %1359 = vmatprep.subr.bf16.mxu1 %v1884_v0  ;;  %v1398_v50 = vpack.c.bf16 %v720_v49, %v719_v47  ;;  %v817_v30 = vld [vmem:[#allocation15 + $0x58] sm:$0xff]  ;;  %v818_v32 = vld [vmem:[#allocation15 + $0x60] sm:$0xff]  ;;  %v819_v33 = vld [vmem:[#allocation15 + $0x68] sm:$0xff] }
 0x109   : > { %v820_v40 = vld [vmem:[#allocation15 + $0x70] sm:$0xff] }
 0x10a   : > { %1337 = vmatpush3.bf16.msra.mxu0 %v1336_v55  ;;  %v724_v55 = vld [vmem:[#allocation14 + $0x38] sm:$0xff] }
 0x10b   : > { %1361 = vmatpush3.bf16.msra.mxu1 %v1360_v57  ;;  %1363 = vmatprep.subr.bf16.mxu0 %v1362_v59  ;;  %v1404_v56 = vpack.c.bf16 %v724_v55, %v723_v54  ;;  %v725_v57 = vld [vmem:[#allocation14 + $0x40] sm:$0xff] }
 0x10c   : > { %1394 = vmatprep.subr.bf16.mxu1 %v1884_v0  ;;  %v1407_v59 = vpack.c.bf16 %v726_v58, %v725_v57 }
 0x10d   : > { %1207 = vmatmul.mubr.f32.vlgmr.msra.gmra.mrb[0].mxu0 %v424_v2 }
 0x10e   : > { %1242 = vmatmul.mubr.f32.vlgmr.msra.gmra.mrb[0].mxu1 %v429_v4  ;;  %1365 = vmatpush3.bf16.msra.mxu0 %v1364_v3 }
 0x10f   : > { %1367 = vmatprep.subr.bf16.mxu0 %v1366_v5  ;;  %1276 = vmatprep.mubr.msk.f32.mxu1 %vm1885_vm0, %v1886_v1 }
 0x110   : > { %1396 = vmatpush3.bf16.msra.mxu1 %v1395_v48 }
 0x111   : > { %1397 = vmatprep.subr.bf16.mxu1 %v1884_v0 }
 0x112   : > { %1369 = vmatpush3.bf16.msra.mxu0 %v1368_v10  ;;  %v730_v10 = vld [vmem:[#allocation14 + $0x68] sm:$0xff] }
 0x113   : > { %1371 = vmatprep.subr.bf16.mxu0 %v1370_v11  ;;  %v1413_v11 = vpack.c.bf16 %v730_v10, %v729_v9 }
 0x114   : > { %1399 = vmatpush3.bf16.msra.mxu1 %v1398_v50 }
 0x115   : > { %1400 = vmatprep.subr.bf16.mxu1 %v1884_v0 }
 0x116   : > { %1373 = vmatpush3.bf16.msra.mxu0 %v1372_v16  ;;  %v807_v16 = vld [vmem:[#allocation15 + $0x8] sm:$0xff] }
 0x117   : > { %1375 = vmatprep.subr.bf16.mxu0 %v1374_v17  ;;  %v808_v17 = vld [vmem:[#allocation15 + $0x10] sm:$0xff]  ;;  %v1419_v18 = vpack.c.bf16 %v807_v16, %v806_v15 }
 0x118   : > { %1402 = vmatpush3.bf16.msra.mxu1 %v1401_v53  ;;  %v1422_v20 = vpack.c.bf16 %v809_v19, %v808_v17 }
 0x119   : > { %1403 = vmatprep.subr.bf16.mxu1 %v1884_v0 }
 0x11a   : > { %1377 = vmatpush3.bf16.msra.mxu0 %v1376_v22 }
 0x11b   : > { %1379 = vmatprep.subr.bf16.mxu0 %v1378_v23  ;;  %v812_v23 = vld [vmem:[#allocation15 + $0x30] sm:$0xff] }
 0x11c   : > { %1405 = vmatpush3.bf16.msra.mxu1 %v1404_v56  ;;  %v1428_v25 = vpack.c.bf16 %v813_v24, %v812_v23 }
 0x11d   : > { %1406 = vmatprep.subr.bf16.mxu1 %v1884_v0 }
 0x11e   : > { %1381 = vmatpush3.bf16.msra.mxu0 %v1380_v28  ;;  %v1431_v28 = vpack.c.bf16 %v815_v27, %v814_v26 }
 0x11f   : > { %1383 = vmatprep.subr.bf16.mxu0 %v1382_v29  ;;  %v816_v29 = vld [vmem:[#allocation15 + $0x50] sm:$0xff] }
 0x120   : > { %1408 = vmatpush3.bf16.msra.mxu1 %v1407_v59  ;;  %v1434_v31 = vpack.c.bf16 %v817_v30, %v816_v29 }
 0x121   : > { %1409 = vmatprep.subr.bf16.mxu1 %v1884_v0 }
 0x122   : > { %1385 = vmatpush3.bf16.msra.mxu0 %v1384_v34  ;;  %v1437_v34 = vpack.c.bf16 %v819_v33, %v818_v32 }
 0x123   : > { %1387 = vmatprep.subr.bf16.mxu0 %v1386_v35 }
 0x124   : > { %1411 = vmatpush3.bf16.msra.mxu1 %v1410_v62 }
 0x125   : > { %1412 = vmatprep.subr.bf16.mxu1 %v1884_v0 }
 0x126   : > { %1389 = vmatpush3.bf16.msra.mxu0 %v1388_v38 }
 0x127   : > { %1391 = vmatprep.subr.bf16.mxu0 %v1390_v41  ;;  %v821_v41 = vld [vmem:[#allocation15 + $0x78] sm:$0xff] }
 0x128   : > { %1414 = vmatpush3.bf16.msra.mxu1 %v1413_v11  ;;  %v1440_v42 = vpack.c.bf16 %v821_v41, %v820_v40 }
 0x129   : > { %1415 = vmatprep.subr.bf16.mxu1 %v1884_v0 }
 0x12a   : > { %1393 = vmatpush3.bf16.msra.mxu0 %v1392_v44 }
 0x12b   : > { %1418 = vmatprep.subr.bf16.mxu0 %v1884_v0 }
 0x12c   : > { %1417 = vmatpush3.bf16.msra.mxu1 %v1416_v14 }
 0x1e0   : > { %v512_v63 = vpop.f32.mrb[0].mxu0 }
 0x1e1   : > { %vm516_vm3 = vcmp.gt.f32.partialorder %v512_v63, 0.0  ;;  %v517_v2 = vmul.f32 0.01, %v512_v63  ;;  %v601_v3 = vpop.f32.mrb[0].mxu1  ;;  %v1208_v4 = vpop.f32.mrb[1].mxu0 }
 0x1e2   : > { %vm605_vm4 = vcmp.gt.f32.partialorder %v601_v3, 0.0  ;;  %v606_v5 = vmul.f32 0.01, %v601_v3  ;;  %v1243_v6 = vpop.f32.mrb[1].mxu1 }
 0x1e3   : > { %v518_v7 = vsel %vm516_vm3, %v512_v63, %v517_v2 }
 0x1e4   : > { %v607_v8 = vsel %vm605_vm4, %v601_v3, %v606_v5 }
 0x1e5   : > { %708 = vmatprep.mubr.f32.mxu0 %v607_v8 }
 0x1e6   : > { %709 = vmatmul.mubr.f32.vlgmr.msra.gmra.mrb[2].mxu0 %v518_v7 }
 0x1e7   : > { %1311 = vmatprep.mubr.msk.f32.mxu0 %vm1885_vm0, %v1886_v1  ;;  %1420 = vmatpush3.bf16.msra.mxu0 %v1419_v18  ;;  %v810_v1 = vld [vmem:[#allocation15 + $0x20] sm:$0xff] }
 0x1e8   : > { %1421 = vmatprep.subr.bf16.mxu0 %v1884_v0  ;;  %v1425_v22 = vpack.c.bf16 %v811_v21, %v810_v1 }
 0x1eb   : > { %1423 = vmatpush3.bf16.msra.mxu0 %v1422_v20 }
 0x1ec   : > { %1424 = vmatprep.subr.bf16.mxu0 %v1884_v0 }
 0x1ef   : > { %1426 = vmatpush3.bf16.msra.mxu0 %v1425_v22 }
 0x1f0   : > { %1427 = vmatprep.subr.bf16.mxu0 %v1884_v0 }
 0x1f3   : > { %1429 = vmatpush3.bf16.msra.mxu0 %v1428_v25 }
 0x1f4   : > { %1430 = vmatprep.subr.bf16.mxu0 %v1884_v0 }
 0x1f7   : > { %1432 = vmatpush3.bf16.msra.mxu0 %v1431_v28 }
 0x1f8   : > { %1433 = vmatprep.subr.bf16.mxu0 %v1884_v0 }
 0x1fb   : > { %1435 = vmatpush3.bf16.msra.mxu0 %v1434_v31 }
 0x1fc   : > { %1436 = vmatprep.subr.bf16.mxu0 %v1884_v0 }
 0x1ff   : > { %1438 = vmatpush3.bf16.msra.mxu0 %v1437_v34 }
 0x200   : > { %1439 = vmatprep.subr.bf16.mxu0 %v1884_v0 }
 0x203   : > { %1441 = vmatpush3.bf16.msra.mxu0 %v1440_v42 }
 0x2b9   : > { %v1137_v35 = vpop.f32.mrb[2].mxu0 }
 0x2ba   : > { %v1138_v36 = vpop.f32.mrb[3].mxu0 }
 0x2bb   : > { %v1139_v37 = vadd.f32 %v1138_v36, %v1137_v35 }
 0x2bd   : > { %vm714_vm5 = vcmp.gt.f32.partialorder %v1139_v37, 0.0  ;;  %v715_v38 = vmul.f32 0.01, %v1139_v37 }
 0x2bf   : > { %v716_v39 = vsel %vm714_vm5, %v1139_v37, %v715_v38 }
 0x2c0   : > { %1277 = vmatmul.mubr.f32.vlgmr.msra.gmra.mrb[2].mxu1 %v716_v39 }
 0x393   : > { %v799_v43 = vpop.f32.mrb[2].mxu1 }
 0x394   : > { %vm803_vm6 = vcmp.gt.f32.partialorder %v799_v43, 0.0  ;;  %v804_v44 = vmul.f32 0.01, %v799_v43  ;;  %v1278_v45 = vpop.f32.mrb[3].mxu1 }
 0x396   : > { %v805_v0 = vsel %vm803_vm6, %v799_v43, %v804_v44 }
 0x397   : > { %1312 = vmatmul.mubr.f32.vlgmr.msra.gmra.mrb[4].mxu0 %v805_v0 }
 0x46a   : > { %v888_v46 = vpop.f32.mrb[4].mxu0 }
 0x46b   : > { %v892_v47 = vmax.f32 %v888_v46, 0.0  ;;  %v1313_v48 = vpop.f32.mrb[5].mxu0 }
 0x46d   : > { %893 = vst [vmem:[%s418_s20] sm:$0xff] %v892_v47 }
 0x46e   : > { %1803 = shalt.err (!%p1800_p0)
}
 0x46f   : > { %s1804_s17 = scalar_lea.hbm %s2280_s15, 128  ;;  %s1808_s14 = scalar_lea.hbm %s2332_s8, 256 }
 0x470   : > { %p1805_p2 = scmp.ne.s32.totalorder %s2280_s15, %s1804_s17  ;;  %p1809_p12 = scmp.lt.u32.totalorder %s2280_s15, %s2332_s8 }
 0x471   : > { %p1810_p11 = scmp.lt.u32.totalorder %s1808_s14, %s1804_s17  ;;  %p1812_p5 = scmp.lt.u32.totalorder %s1804_s17, %s2280_s15 }
 0x472   : > { %p1806_p8 = pnand %p1805_p2, %p2355_p7 }
 0x473   : > { %p1811_p13 = por %p1810_p11, %p1809_p12 }
 0x474   : > { %p1807_p10 = pneg %p1806_p8 }
 0x475   : > { %p1813_p4 = por %p1812_p5, %p1811_p13 }
 0x477   : > { %p1814_p1 = pnand %p1813_p4, %p1807_p10 }
 0x479   : > { %1817 = shalt.err (!%p1814_p1)
}
 0x47a   : > { %1472 = dma.vmem_to_hbm [thread:$0]  (%p2355_p7), %s2282_s10, 128, %s2280_s15, %s895_s26  }
 0x47b PF: > { %s920_s13 = sand.u32 1, %s1860_s27   ;;  %p2356_p3 = scmp.ne.s32.totalorder %s2344_s18, 0 }
 0x47c   : > { %p2357_p9 = scmp.ge.s32.totalorder %s1872_s30, 2  ;;  %s921_s19 = scalar_lea.sflag [#allocation5], %s920_s13 }
 0x47e   : > { %p1501_p6 = pnand %p2357_p9, %p2356_p3 }
 0x480   : > { %1855 = dma.done.wait (!%p1501_p6), %s921_s19, 128  }
 0x481   : > { %1857 = vsyncadd (!%p1501_p6), %s921_s19, 4294967168  ;;  %p25_p0 = scmp.ge.s32.totalorder %s2135_s23, 4   ;;  %s2358_s27 = smov %s1864_s28 }
 0x482   : > { %s2359_s28 = smov %s1868_s29  ;;  %s2360_s29 = smov %s2147_s1 }
 0x483   : > { %s2361_s30 = smov %s2135_s23  ;;  %27 = sbr.rel (!%p25_p0) target bundleno = 11 (0xb), region = 125 }
 0x48a   :  { %926 = vsyncpa [#allocation4], 1 }
 0x48b   :  { %928 = vsyncpa [#allocation4 + $0x1], 1 }
 0x48c   :  { %929 = vsyncpa [#allocation7], 1 }
 0x48d   :  { %930 = vsyncpa [#allocation10], 1 }
 0x48e   :  { %931 = vsyncpa [#allocation13], 1 }
 0x48f   :  { %932 = vsyncpa [#allocation16], 1 }
 0x490   :  { %933 = vsyncpa [#allocation5], 1 }
 0x491   :  { %935 = vsyncpa [#allocation5 + $0x1], 1 }

// kernel: tpu_custom_call.1
= control target key start
LH: loop header
LB: loop body
LE: loop exit
PB: predicated region body
PF: predicated region fallthrough
CT: control target
= control target key end

     0   :  { %s2324_s0 = inlined_call_operand.hbm [shape: f32[2,8,128], index: 0, kind: input, shape index: {}]   ;;  %s2325_s1 = inlined_call_operand.hbm [shape: f32[8,128], index: 1, kind: input, shape index: {}]   ;;  %s2326_s2 = inlined_call_operand.hbm [shape: f32[8,128], index: 2, kind: input, shape index: {}]   ;;  %s2327_s3 = inlined_call_operand.hbm [shape: f32[128,128], index: 3, kind: input, shape index: {}]   ;;  %s2328_s4 = inlined_call_operand.hbm [shape: f32[128,128], index: 4, kind: input, shape index: {}]   ;;  %s2329_s5 = inlined_call_operand.hbm [shape: f32[256,128], index: 5, kind: input, shape index: {}]   ;;  %s2330_s6 = inlined_call_operand.hbm [shape: f32[128,128], index: 6, kind: input, shape index: {}]   ;;  %s2331_s7 = inlined_call_operand.hbm [shape: f32[128,128], index: 7, kind: input, shape index: {}]   ;;  %s2332_s8 = inlined_call_operand.hbm [shape: f32[2,8,128], index: 8, kind: output, shape index: {}]  }
   0x1   :  { %2336 = sst [smem:[#allocation24_spill]] %s2325_s1 }
   0x2   :  { %13 = vsyncpa [#allocation4], 0 }
   0x3   :  { %15 = vsyncpa [#allocation4 + $0x1], 0 }
   0x4   :  { %16 = vsyncpa [#allocation7], 0 }
   0x5   :  { %17 = vsyncpa [#allocation10], 0 }
   0x6   :  { %18 = vsyncpa [#allocation13], 0 }
   0x7   :  { %19 = vsyncpa [#allocation16], 0 }
   0x8   :  { %20 = vsyncpa [#allocation5], 0 }
   0x9   :  { %22 = vsyncpa [#allocation5 + $0x1], 0  ;;  %s1933_s27 = smov 0   ;;  %s1935_s28 = smov 0  }
   0xa   :  { %s1937_s29 = smov 0   ;;  %s1939_s30 = smov 0  }
   0xb LB: > { %s1874_s9 = smov [#allocation6]   ;;  %s1954_s11 = sadd.s32 4294967295, %s1872_s30   ;;  %s1872_s30 = sphi %s1939_s30, %s2361_s30   ;;  %s1868_s29 = sphi %s1937_s29, %s2360_s29   ;;  %s1864_s28 = sphi %s1935_s28, %s2359_s28   ;;  %s1860_s27 = sphi %s1933_s27, %s2358_s27  }
   0xc   : > { %s245_s10 = sshll.u32 %s1874_s9, 4  ;;  %p1046_p0 = scmp.ge.s32.totalorder %s1872_s30, 1  ;;  %s246_s10 = int_to_ptr.vmem [resolvable:$true] %s245_s10 }
   0xd   : > { %p2333_p1 = scmp.eq.s32.totalorder %s1954_s11, 0  ;;  %p232_p2 = scmp.lt.s32.totalorder %s1872_s30, 3 }
   0xe   : > { %s1875_s13 = smov [#allocation9]   ;;  %s1876_s16 = smov [#allocation12]  }
   0xf   : > { %p1959_p3 = pnand %p1046_p0, %p232_p2  ;;  %s266_s14 = sshll.u32 %s1875_s13, 4  ;;  %s1966_s14 = int_to_ptr.vmem [resolvable:$true] %s266_s14 }
  0x10   : > { %s292_s17 = sshll.u32 %s1876_s16, 4  ;;  %s2339_s1 = sld [smem:[#allocation24_spill]]  ;;  %s1974_s17 = int_to_ptr.vmem [resolvable:$true] %s292_s17 }
  0x11   : > { %s2337_s12 = scalar_select %p1959_p3, 1, 0 }
  0x12   : > { %p1474_p5 = pneg %p1959_p3 }
  0x14   : > { %p1970_p6 = pnand %p1474_p5, %p2333_p1 }
  0x16   : > { %s1564_s20 = scalar_lea.hbm %s2339_s1, 128  ;;  %p1984_p8 = pneg %p1970_p6 }
  0x17   : > { %p1565_p7 = scmp.ne.s32.totalorder %s2339_s1, %s1564_s20  ;;  %p1571_p11 = scmp.lt.u32.totalorder %s1564_s20, %s2339_s1 }
  0x19   : > { %p1567_p9 = pnand %p1984_p8, %p1565_p7 }
  0x1b   : > { %p1568_p10 = pneg %p1567_p9 }
  0x1d   : > { %p1573_p12 = pnand %p1571_p11, %p1568_p10 }
  0x1f   : > { %1576 = shalt.err (!%p1573_p12)
}
  0x20   : > { %s1577_s26 = scalar_lea.vmem %s246_s10, 128  ;;  %p1585_p5 = scmp.lt.s32.totalorder %s246_s10, %s246_s10 }
  0x21   : > { %p1578_p13 = scmp.ne.s32.totalorder %s246_s10, %s1577_s26  ;;  %p1586_p4 = scmp.lt.s32.totalorder %s1577_s26, %s1577_s26 }
  0x23   : > { %p1580_p0 = pnand %p1578_p13, %p1984_p8  ;;  %p1587_p1 = por %p1586_p4, %p1585_p5 }
  0x25   : > { %p1581_p2 = pneg %p1580_p0 }
  0x27   : > { %p1588_p3 = pnand %p1587_p1, %p1581_p2 }
  0x29   : > { %1591 = shalt.err (!%p1588_p3)
}
  0x2a   : > { %1477 = dma.hbm_to_vmem [thread:$0]  (!%p1970_p6), %s2339_s1, 128, %s246_s10, [#allocation7]  }
  0x2b   : > { %s1592_s19 = scalar_lea.hbm %s2327_s3, 2048 }
  0x2c   : > { %p1593_p7 = scmp.ne.s32.totalorder %s2327_s3, %s1592_s19  ;;  %p1599_p1 = scmp.lt.u32.totalorder %s1592_s19, %s2327_s3 }
  0x2e   : > { %p1595_p9 = pnand %p1593_p7, %p1984_p8 }
  0x30   : > { %p1596_p4 = pneg %p1595_p9 }
  0x32   : > { %p1601_p3 = pnand %p1599_p1, %p1596_p4 }
  0x34   : > { %1604 = shalt.err (!%p1601_p3)
}
  0x35   : > { %s1605_s10 = scalar_lea.vmem %s1966_s14, 2048  ;;  %p1613_p13 = scmp.lt.s32.totalorder %s1966_s14, %s1966_s14 }
  0x36   : > { %p1606_p10 = scmp.ne.s32.totalorder %s1966_s14, %s1605_s10  ;;  %p1614_p0 = scmp.lt.s32.totalorder %s1605_s10, %s1605_s10 }
  0x38   : > { %p1608_p11 = pnand %p1606_p10, %p1984_p8  ;;  %p1615_p2 = por %p1614_p0, %p1613_p13 }
  0x3a   : > { %p1609_p12 = pneg %p1608_p11 }
  0x3c   : > { %p1616_p5 = pnand %p1615_p2, %p1609_p12 }
  0x3e   : > { %1619 = shalt.err (!%p1616_p5)
}
  0x3f   : > { %s1877_s25 = smov 128   ;;  %s1878_s26 = smov 8  }
  0x40   : > { %1483 = dma.hbm_to_vmem [thread:$0]  (!%p1970_p6), %s2327_s3, 2048, %s1966_s14, [#allocation10], %s1877_s25, %s1877_s25, %s1878_s26  }
  0x41   : > { %s1620_s19 = scalar_lea.hbm %s2329_s5, 4096 }
  0x42   : > { %p1621_p7 = scmp.ne.s32.totalorder %s2329_s5, %s1620_s19  ;;  %p1627_p1 = scmp.lt.u32.totalorder %s1620_s19, %s2329_s5 }
  0x44   : > { %p1623_p9 = pnand %p1621_p7, %p1984_p8 }
  0x46   : > { %p1624_p4 = pneg %p1623_p9 }
  0x48   : > { %p1629_p3 = pnand %p1627_p1, %p1624_p4 }
  0x4a   : > { %1632 = shalt.err (!%p1629_p3)
}
  0x4b   : > { %s1633_s14 = scalar_lea.vmem %s1974_s17, 4096  ;;  %p1641_p13 = scmp.lt.s32.totalorder %s1974_s17, %s1974_s17 }
  0x4c   : > { %p1634_p10 = scmp.ne.s32.totalorder %s1974_s17, %s1633_s14  ;;  %p1642_p0 = scmp.lt.s32.totalorder %s1633_s14, %s1633_s14 }
  0x4e   : > { %p1636_p11 = pnand %p1634_p10, %p1984_p8  ;;  %p1643_p2 = por %p1642_p0, %p1641_p13 }
  0x50   : > { %p1637_p12 = pneg %p1636_p11 }
  0x52   : > { %p1644_p5 = pnand %p1643_p2, %p1637_p12 }
  0x54   : > { %1647 = shalt.err (!%p1644_p5)
}
  0x55   : > { %1489 = dma.hbm_to_vmem [thread:$0]  (!%p1970_p6), %s2329_s5, 4096, %s1974_s17, [#allocation13], %s1877_s25, %s1877_s25, %s1878_s26  }
  0x56   : > { %s1879_s13 = smov [#allocation8]   ;;  %s1880_s18 = smov [#allocation11]  }
  0x57   : > { %s256_s16 = sshll.u32 %s1879_s13, 4  ;;  %s279_s19 = sshll.u32 %s1880_s18, 4  ;;  %s257_s16 = int_to_ptr.vmem [resolvable:$true] %s256_s16  ;;  %s280_s19 = int_to_ptr.vmem [resolvable:$true] %s279_s19 }
  0x58   : > { %s1648_s22 = scalar_lea.hbm %s2326_s2, 128 }
  0x59   : > { %p1649_p7 = scmp.ne.s32.totalorder %s2326_s2, %s1648_s22  ;;  %p1655_p1 = scmp.lt.u32.totalorder %s1648_s22, %s2326_s2 }
  0x5b   : > { %p1651_p9 = pnand %p1649_p7, %p1984_p8 }
  0x5d   : > { %p1652_p4 = pneg %p1651_p9 }
  0x5f   : > { %p1657_p3 = pnand %p1655_p1, %p1652_p4 }
  0x61   : > { %1660 = shalt.err (!%p1657_p3)
}
  0x62   : > { %s1661_s17 = scalar_lea.vmem %s257_s16, 128  ;;  %p1669_p13 = scmp.lt.s32.totalorder %s257_s16, %s257_s16 }
  0x63   : > { %p1662_p10 = scmp.ne.s32.totalorder %s257_s16, %s1661_s17  ;;  %p1670_p0 = scmp.lt.s32.totalorder %s1661_s17, %s1661_s17 }
  0x65   : > { %p1664_p11 = pnand %p1662_p10, %p1984_p8  ;;  %p1671_p2 = por %p1670_p0, %p1669_p13 }
  0x67   : > { %p1665_p12 = pneg %p1664_p11 }
  0x69   : > { %p1672_p5 = pnand %p1671_p2, %p1665_p12 }
  0x6b   : > { %1675 = shalt.err (!%p1672_p5)
}
  0x6c   : > { %1480 = dma.hbm_to_vmem [thread:$0]  (!%p1970_p6), %s2326_s2, 128, %s257_s16, [#allocation7]  }
  0x6d   : > { %s1676_s20 = scalar_lea.hbm %s2328_s4, 2048 }
  0x6e   : > { %p1677_p7 = scmp.ne.s32.totalorder %s2328_s4, %s1676_s20  ;;  %p1683_p1 = scmp.lt.u32.totalorder %s1676_s20, %s2328_s4 }
  0x70   : > { %p1679_p9 = pnand %p1677_p7, %p1984_p8 }
  0x72   : > { %p1680_p4 = pneg %p1679_p9 }
  0x74   : > { %p1685_p3 = pnand %p1683_p1, %p1680_p4 }
  0x76   : > { %1688 = shalt.err (!%p1685_p3)
}
  0x77   : > { %s1689_s10 = scalar_lea.vmem %s280_s19, 2048  ;;  %p1697_p13 = scmp.lt.s32.totalorder %s280_s19, %s280_s19 }
  0x78   : > { %p1690_p10 = scmp.ne.s32.totalorder %s280_s19, %s1689_s10  ;;  %p1698_p0 = scmp.lt.s32.totalorder %s1689_s10, %s1689_s10 }
  0x7a   : > { %p1692_p11 = pnand %p1690_p10, %p1984_p8  ;;  %p1699_p2 = por %p1698_p0, %p1697_p13 }
  0x7c   : > { %p1693_p12 = pneg %p1692_p11 }
  0x7e   : > { %p1700_p5 = pnand %p1699_p2, %p1693_p12 }
  0x80   : > { %1703 = shalt.err (!%p1700_p5)
}
  0x81   : > { %1486 = dma.hbm_to_vmem [thread:$0]  (!%p1970_p6), %s2328_s4, 2048, %s280_s19, [#allocation10], %s1877_s25, %s1877_s25, %s1878_s26  }
  0x82   : > { %s1881_s9 = smov [#allocation14]   ;;  %s1882_s1 = smov [#allocation15]  }
  0x83   : > { %s305_s13 = sshll.u32 %s1881_s9, 4  ;;  %s318_s18 = sshll.u32 %s1882_s1, 4  ;;  %s306_s13 = int_to_ptr.vmem [resolvable:$true] %s305_s13  ;;  %s319_s18 = int_to_ptr.vmem [resolvable:$true] %s318_s18 }
  0x84   : > { %s1704_s22 = scalar_lea.hbm %s2330_s6, 2048 }
  0x85   : > { %p1705_p7 = scmp.ne.s32.totalorder %s2330_s6, %s1704_s22  ;;  %p1711_p1 = scmp.lt.u32.totalorder %s1704_s22, %s2330_s6 }
  0x87   : > { %p1707_p9 = pnand %p1705_p7, %p1984_p8 }
  0x89   : > { %p1708_p4 = pneg %p1707_p9 }
  0x8b   : > { %p1713_p3 = pnand %p1711_p1, %p1708_p4 }
  0x8d   : > { %1716 = shalt.err (!%p1713_p3)
}
  0x8e   : > { %s1717_s19 = scalar_lea.vmem %s306_s13, 2048  ;;  %p1725_p13 = scmp.lt.s32.totalorder %s306_s13, %s306_s13 }
  0x8f   : > { %p1718_p10 = scmp.ne.s32.totalorder %s306_s13, %s1717_s19  ;;  %p1726_p0 = scmp.lt.s32.totalorder %s1717_s19, %s1717_s19 }
  0x91   : > { %p1720_p11 = pnand %p1718_p10, %p1984_p8  ;;  %p1727_p2 = por %p1726_p0, %p1725_p13 }
  0x93   : > { %p1721_p12 = pneg %p1720_p11 }
  0x95   : > { %p1728_p5 = pnand %p1727_p2, %p1721_p12 }
  0x97   : > { %1731 = shalt.err (!%p1728_p5)
}
  0x98   : > { %1492 = dma.hbm_to_vmem [thread:$0]  (!%p1970_p6), %s2330_s6, 2048, %s306_s13, [#allocation13], %s1877_s25, %s1877_s25, %s1878_s26  }
  0x99   : > { %s1732_s21 = scalar_lea.hbm %s2331_s7, 2048 }
  0x9a   : > { %p1733_p7 = scmp.ne.s32.totalorder %s2331_s7, %s1732_s21  ;;  %p1739_p1 = scmp.lt.u32.totalorder %s1732_s21, %s2331_s7 }
  0x9c   : > { %p1735_p9 = pnand %p1733_p7, %p1984_p8 }
  0x9e   : > { %p1736_p4 = pneg %p1735_p9 }
  0xa0   : > { %p1741_p3 = pnand %p1739_p1, %p1736_p4 }
  0xa2   : > { %1744 = shalt.err (!%p1741_p3)
}
  0xa3   : > { %s1745_s16 = scalar_lea.vmem %s319_s18, 2048  ;;  %p1753_p13 = scmp.lt.s32.totalorder %s319_s18, %s319_s18 }
  0xa4   : > { %p1746_p10 = scmp.ne.s32.totalorder %s319_s18, %s1745_s16  ;;  %p1754_p0 = scmp.lt.s32.totalorder %s1745_s16, %s1745_s16 }
  0xa6   : > { %p1748_p11 = pnand %p1746_p10, %p1984_p8  ;;  %p1755_p2 = por %p1754_p0, %p1753_p13 }
  0xa8   : > { %p1749_p12 = pneg %p1748_p11 }
  0xaa   : > { %p1756_p5 = pnand %p1755_p2, %p1749_p12 }
  0xac   : > { %1759 = shalt.err (!%p1756_p5)
}
  0xad   : > { %1495 = dma.hbm_to_vmem [thread:$0]  (!%p1970_p6), %s2331_s7, 2048, %s319_s18, [#allocation16], %s1877_s25, %s1877_s25, %s1878_s26  }
  0xae   : > { %s1045_s15 = sadd.s32 4294967294, %s1872_s30   ;;  %s2135_s23 = sadd.s32 1, %s1872_s30  }
  0xaf   : > { %s35_s17 = sadd.s32 1, %s1868_s29  ;;  %s32_s9 = ssub.s32 %s1872_s30, %s2135_s23 }
  0xb0   : > { %p42_p8 = scmp.ne.s32.totalorder %s1868_s29, %s1864_s28  ;;  %p33_p7 = scmp.eq.s32.totalorder %s32_s9, 0 }
  0xb1   : > { %p43_p9 = scmp.eq.s32.totalorder %s1872_s30, 0  ;;  %p48_p4 = scmp.ne.s32.totalorder %s1864_s28, %s1860_s27 }
  0xb2   : > { %p219_p1 = scmp.eq.s32.totalorder %s1954_s11, 1  ;;  %p2341_p10 = scmp.eq.s32.totalorder %s1954_s11, 0 }
  0xb3   : > { %s2147_s1 = scalar_select %p33_p7, %s1868_s29, %s35_s17  }
  0xb4   : > { %p44_p3 = por %p43_p9, %p42_p8  ;;  %p2151_p11 = por %p2341_p10, %p48_p4 }
  0xb5   : > { %p2155_p6 = por %p219_p1, %p42_p8  ;;  %p225_p12 = scmp.eq.s32.totalorder %s1045_s15, 1 }
  0xb6   : > { %p1511_p13 = scmp.lt.s32.totalorder %s1872_s30, 2  ;;  %s332_s26 = sand.u32 1, %s1868_s29  }
  0xb7   : > { %s2343_s25 = scalar_select %p2155_p6, 1, 0 }
  0xb8   : > { %p2161_p0 = por %p225_p12, %p48_p4  ;;  %s1055_s21 = sshll.u32 %s332_s26, 3 }
  0xb9   : > { %s1056_s22 = sshll.u32 %s1872_s30, 7  ;;  %s336_s16 = scalar_lea.vmem [#allocation3], %s1055_s21 }
  0xba   : > { %s2344_s18 = scalar_select %p2161_p0, 1, 0 }
  0xbb   : > { %s2169_s10 = scalar_lea.hbm %s2324_s0, %s1056_s22  ;;  %s343_s13 = sshll.u32 %s336_s16, 4  ;;  %s2175_s13 = int_to_ptr.vmem [resolvable:$true] %s343_s13 }
  0xbc   : > { %p2171_p2 = pnand %p1511_p13, %p44_p3  ;;  %s333_s15 = scalar_lea.sflag [#allocation4], %s332_s26 }
  0xbd   : > { %s1760_s17 = scalar_lea.hbm %s2169_s10, 128  ;;  %s1765_s22 = scalar_lea.hbm %s2324_s0, 256 }
  0xbe   : > { %p1761_p5 = scmp.ne.s32.totalorder %s2169_s10, %s1760_s17  ;;  %p1762_p8 = pneg %p2171_p2 }
  0xbf   : > { %p1766_p4 = scmp.lt.u32.totalorder %s2169_s10, %s2324_s0  ;;  %p1767_p1 = scmp.lt.u32.totalorder %s1765_s22, %s1760_s17 }
  0xc0   : > { %p1763_p7 = pnand %p1762_p8, %p1761_p5  ;;  %p1769_p10 = scmp.lt.u32.totalorder %s1760_s17, %s2169_s10 }
  0xc1   : > { %p1768_p3 = por %p1767_p1, %p1766_p4 }
  0xc2   : > { %p1764_p9 = pneg %p1763_p7 }
  0xc3   : > { %p1770_p12 = por %p1769_p10, %p1768_p3 }
  0xc5   : > { %p1771_p13 = pnand %p1770_p12, %p1764_p9 }
  0xc7   : > { %1774 = shalt.err (!%p1771_p13)
}
  0xc8   : > { %s1775_s26 = scalar_lea.vmem %s2175_s13, 128  ;;  %s1883_s16 = smov [#allocation3]  }
  0xc9   : > { %p1776_p5 = scmp.ne.s32.totalorder %s2175_s13, %s1775_s26  ;;  %s1780_s9 = sshll.u32 %s1883_s16, 4  ;;  %s1781_s9 = int_to_ptr.vmem [resolvable:$false] %s1780_s9 }
  0xca   : > { %s1782_s21 = scalar_lea.vmem %s1781_s9, 256  ;;  %p1783_p6 = scmp.lt.s32.totalorder %s2175_s13, %s1781_s9 }
  0xcb   : > { %p1778_p7 = pnand %p1776_p5, %p1762_p8  ;;  %p1784_p4 = scmp.lt.s32.totalorder %s1782_s21, %s1775_s26 }
  0xcd   : > { %p1779_p0 = pneg %p1778_p7  ;;  %p1785_p1 = por %p1784_p4, %p1783_p6 }
  0xcf   : > { %p1786_p3 = pnand %p1785_p1, %p1779_p0 }
  0xd1   : > { %1789 = shalt.err (!%p1786_p3)
}
  0xd2   : > { %1499 = dma.hbm_to_vmem [thread:$0]  (!%p2171_p2), %s2169_s10, 128, %s2175_s13, %s333_s15  }
  0xd3   : > { %p2346_p9 = scmp.ne.s32.totalorder %s2337_s12, 0 }
  0xd4   : > { %s2205_s17 = sand.u32 (!%p2346_p9), 1, %s1864_s28  }
  0xd5   : > { %352 = sbr.rel (%p2346_p9) target bundleno = 1147 (0x47b), region = 52  ;;  %s1058_s22 = sshll.u32 (!%p2346_p9), %s2205_s17, 3 }
  0xd6   : > { %s355_s24 = scalar_lea.sflag (!%p2346_p9), [#allocation4], %s2205_s17  ;;  %s2211_s14 = scalar_lea.vmem (!%p2346_p9), [#allocation3], %s1058_s22 }
  0xdc   : > { %1835 = dma.done.wait (%p2151_p11), %s355_s24, 128  }
  0xdd   : > { %1837 = vsyncadd (%p2151_p11), %s355_s24, 4294967168  ;;  %p2347_p6 = scmp.eq.s32.totalorder %s1954_s11, 0 }
  0xdf   : > { %1839 = dma.done.wait (%p2347_p6), [#allocation7], 256   ;;  %p2348_p0 = pmov %p2347_p6 }
  0xe1   : > { %1841 = vsyncadd (%p2348_p0), [#allocation7], 4294967040  ;;  %p2349_p2 = pmov %p2348_p0 }
  0xe2   : > { %p2350_p8 = pmov %p2348_p0 }
  0xe3   : > { %1843 = dma.done.wait (%p2349_p2), [#allocation10], 4096  }
  0xe4   : > { %1845 = vsyncadd (%p2350_p8), [#allocation10], 4294963200  ;;  %p2351_p10 = pmov %p2348_p0 }
  0xe5   : > { %p2352_p12 = pmov %p2348_p0 }
  0xe6   : > { %1847 = dma.done.wait (%p2351_p10), [#allocation13], 6144  }
  0xe7   : > { %1849 = vsyncadd (%p2352_p12), [#allocation13], 4294961152  ;;  %p2353_p11 = pmov %p2348_p0 }
  0xe8   : > { %p2354_p13 = pmov %p2348_p0 }
  0xe9   : > { %1851 = dma.done.wait (%p2353_p11), [#allocation16], 2048  }
  0xea   : > { %1853 = vsyncadd (%p2354_p13), [#allocation16], 4294965248  ;;  %v1884_v0 = vmov 0.0|0.0   ;;  %vm1885_vm0 = vmmov 0   ;;  %v1886_v1 = vmov 0.0   ;;  %v430_v2 = vld [vmem:[#allocation9] sm:$0xff] }
  0xeb   : > { %1314 = vmatprep.subr.bf16.mxu0 %v1884_v0  ;;  %1338 = vmatprep.subr.bf16.mxu1 %v1884_v0  ;;  %v431_v3 = vld [vmem:[#allocation9 + $0x8] sm:$0xff]  ;;  %v519_v4 = vld [vmem:[#allocation11] sm:$0xff]  ;;  %v432_v7 = vld [vmem:[#allocation9 + $0x10] sm:$0xff]  ;;  %s1068_s12 = sshll.u32 %s1954_s11, 7  ;;  %s418_s20 = scalar_lea.vmem [#allocation17], %s1058_s22 }
  0xec   : > { %1206 = vmatprep.mubr.msk.f32.mxu0 %vm1885_vm0, %v1886_v1  ;;  %1241 = vmatprep.mubr.msk.f32.mxu1 %vm1885_vm0, %v1886_v1  ;;  %v1315_v5 = vpack.c.bf16 %v431_v3, %v430_v2  ;;  %v520_v6 = vld [vmem:[#allocation11 + $0x8] sm:$0xff]  ;;  %v433_v8 = vld [vmem:[#allocation9 + $0x18] sm:$0xff]  ;;  %v521_v10 = vld [vmem:[#allocation11 + $0x10] sm:$0xff]  ;;  %s908_s10 = sshll.u32 %s418_s20, 4  ;;  %s2280_s15 = scalar_lea.hbm %s2332_s8, %s1068_s12  ;;  %s2282_s10 = int_to_ptr.vmem [resolvable:$true] %s908_s10 }
  0xed   : > { %v1339_v9 = vpack.c.bf16 %v520_v6, %v519_v4  ;;  %v522_v11 = vld [vmem:[#allocation11 + $0x18] sm:$0xff]  ;;  %v1318_v12 = vpack.c.bf16 %v433_v8, %v432_v7  ;;  %v434_v14 = vld [vmem:[#allocation9 + $0x20] sm:$0xff]  ;;  %v435_v15 = vld [vmem:[#allocation9 + $0x28] sm:$0xff]  ;;  %s895_s26 = scalar_lea.sflag [#allocation5], %s2205_s17  ;;  %s1790_s16 = scalar_lea.vmem %s2282_s10, 128 }
  0xee   : > { %1316 = vmatpush3.bf16.msra.mxu0 %v1315_v5  ;;  %v1342_v13 = vpack.c.bf16 %v522_v11, %v521_v10  ;;  %v523_v16 = vld [vmem:[#allocation11 + $0x20] sm:$0xff]  ;;  %v524_v17 = vld [vmem:[#allocation11 + $0x28] sm:$0xff]  ;;  %v1321_v18 = vpack.c.bf16 %v435_v15, %v434_v14  ;;  %v436_v20 = vld [vmem:[#allocation9 + $0x30] sm:$0xff]  ;;  %p1791_p5 = scmp.ne.s32.totalorder %s2282_s10, %s1790_s16  ;;  %p2355_p7 = scmp.ne.s32.totalorder %s2343_s25, 0 }
  0xef   : > { %1340 = vmatpush3.bf16.msra.mxu1 %v1339_v9  ;;  %1317 = vmatprep.subr.bf16.mxu0 %v1884_v0  ;;  %v1345_v19 = vpack.c.bf16 %v524_v17, %v523_v16  ;;  %v437_v21 = vld [vmem:[#allocation9 + $0x38] sm:$0xff]  ;;  %v525_v22 = vld [vmem:[#allocation11 + $0x30] sm:$0xff]  ;;  %v438_v26 = vld [vmem:[#allocation9 + $0x40] sm:$0xff]  ;;  %s1887_s11 = smov [#allocation17]  }
  0xf0   : > { %1341 = vmatprep.subr.bf16.mxu1 %v1884_v0  ;;  %v526_v23 = vld [vmem:[#allocation11 + $0x38] sm:$0xff]  ;;  %v1324_v24 = vpack.c.bf16 %v437_v21, %v436_v20  ;;  %v439_v27 = vld [vmem:[#allocation9 + $0x48] sm:$0xff]  ;;  %v527_v28 = vld [vmem:[#allocation11 + $0x40] sm:$0xff]  ;;  %p1792_p4 = pnand %p1791_p5, %p2355_p7  ;;  %s1794_s9 = sshll.u32 %s1887_s11, 4  ;;  %s1795_s9 = int_to_ptr.vmem [resolvable:$false] %s1794_s9 }
  0xf1   : > { %v1348_v25 = vpack.c.bf16 %v526_v23, %v525_v22  ;;  %v528_v29 = vld [vmem:[#allocation11 + $0x48] sm:$0xff]  ;;  %v1327_v30 = vpack.c.bf16 %v439_v27, %v438_v26  ;;  %v440_v32 = vld [vmem:[#allocation9 + $0x50] sm:$0xff]  ;;  %v441_v33 = vld [vmem:[#allocation9 + $0x58] sm:$0xff]  ;;  %s1796_s21 = scalar_lea.vmem %s1795_s9, 256  ;;  %p1797_p3 = scmp.lt.s32.totalorder %s2282_s10, %s1795_s9 }
  0xf2   : > { %1319 = vmatpush3.bf16.msra.mxu0 %v1318_v12  ;;  %v1351_v31 = vpack.c.bf16 %v528_v29, %v527_v28  ;;  %v529_v34 = vld [vmem:[#allocation11 + $0x50] sm:$0xff]  ;;  %v530_v35 = vld [vmem:[#allocation11 + $0x58] sm:$0xff]  ;;  %v1330_v36 = vpack.c.bf16 %v441_v33, %v440_v32  ;;  %v442_v37 = vld [vmem:[#allocation9 + $0x60] sm:$0xff]  ;;  %p1793_p1 = pneg %p1792_p4  ;;  %p1798_p9 = scmp.lt.s32.totalorder %s1796_s21, %s1790_s16 }
  0xf3   : > { %1343 = vmatpush3.bf16.msra.mxu1 %v1342_v13  ;;  %1320 = vmatprep.subr.bf16.mxu0 %v1884_v0  ;;  %v1354_v38 = vpack.c.bf16 %v530_v35, %v529_v34  ;;  %v443_v39 = vld [vmem:[#allocation9 + $0x68] sm:$0xff]  ;;  %v420_v41 = vld [vmem:[#allocation6] sm:$0xff]  ;;  %v531_v42 = vld [vmem:[#allocation11 + $0x60] sm:$0xff] }
  0xf4   : > { %1344 = vmatprep.subr.bf16.mxu1 %v1884_v0  ;;  %v419_v40 = vld [vmem:[%s2211_s14] sm:$0xff]  ;;  %v425_v44 = vld [vmem:[#allocation8] sm:$0xff]  ;;  %v1333_v45 = vpack.c.bf16 %v443_v39, %v442_v37  ;;  %v444_v48 = vld [vmem:[#allocation9 + $0x70] sm:$0xff]  ;;  %p1799_p6 = por %p1798_p9, %p1797_p3 }
  0xf5   : > { %v532_v43 = vld [vmem:[#allocation11 + $0x68] sm:$0xff]  ;;  %v421_v46 = vmul.f32 %v420_v41, %v419_v40  ;;  %v445_v49 = vld [vmem:[#allocation9 + $0x78] sm:$0xff]  ;;  %v533_v50 = vld [vmem:[#allocation11 + $0x70] sm:$0xff]  ;;  %v426_v51 = vmul.f32 %v425_v44, %v419_v40 }
  0xf6   : > { %1322 = vmatpush3.bf16.msra.mxu0 %v1321_v18  ;;  %v1357_v47 = vpack.c.bf16 %v532_v43, %v531_v42  ;;  %v534_v52 = vld [vmem:[#allocation11 + $0x78] sm:$0xff]  ;;  %v628_v53 = vld [vmem:[#allocation12 + $0x80] sm:$0xff]  ;;  %v629_v54 = vld [vmem:[#allocation12 + $0x88] sm:$0xff]  ;;  %v1336_v55 = vpack.c.bf16 %v445_v49, %v444_v48  ;;  %p1800_p0 = pnand %p1799_p6, %p1793_p1 }
  0xf7   : > { %1346 = vmatpush3.bf16.msra.mxu1 %v1345_v19  ;;  %1323 = vmatprep.subr.bf16.mxu0 %v1884_v0  ;;  %v423_v56 = vmul.f32 0.01, %v421_v46  ;;  %v1360_v57 = vpack.c.bf16 %v534_v52, %v533_v50  ;;  %vm422_vm1 = vcmp.gt.f32.partialorder %v421_v46, 0.0  ;;  %v428_v58 = vmul.f32 0.01, %v426_v51  ;;  %v612_v60 = vld [vmem:[#allocation12] sm:$0xff] }
  0xf8   : > { %1347 = vmatprep.subr.bf16.mxu1 %v1884_v0  ;;  %v1362_v59 = vpack.c.bf16 %v629_v54, %v628_v53  ;;  %v613_v61 = vld [vmem:[#allocation12 + $0x8] sm:$0xff]  ;;  %vm427_vm2 = vcmp.gt.f32.partialorder %v426_v51, 0.0  ;;  %v630_v62 = vld [vmem:[#allocation12 + $0x90] sm:$0xff]  ;;  %v631_v63 = vld [vmem:[#allocation12 + $0x98] sm:$0xff] }
  0xf9   : > { %v424_v2 = vsel %vm422_vm1, %v421_v46, %v423_v56  ;;  %v1364_v3 = vpack.c.bf16 %v613_v61, %v612_v60  ;;  %v429_v4 = vsel %vm427_vm2, %v426_v51, %v428_v58  ;;  %v1366_v5 = vpack.c.bf16 %v631_v63, %v630_v62  ;;  %v614_v6 = vld [vmem:[#allocation12 + $0x10] sm:$0xff]  ;;  %v615_v7 = vld [vmem:[#allocation12 + $0x18] sm:$0xff]  ;;  %v632_v8 = vld [vmem:[#allocation12 + $0xa0] sm:$0xff] }
  0xfa   : > { %1325 = vmatpush3.bf16.msra.mxu0 %v1324_v24  ;;  %v633_v9 = vld [vmem:[#allocation12 + $0xa8] sm:$0xff]  ;;  %v1368_v10 = vpack.c.bf16 %v615_v7, %v614_v6  ;;  %v616_v12 = vld [vmem:[#allocation12 + $0x20] sm:$0xff]  ;;  %v634_v14 = vld [vmem:[#allocation12 + $0xb0] sm:$0xff] }
  0xfb   : > { %1349 = vmatpush3.bf16.msra.mxu1 %v1348_v25  ;;  %1326 = vmatprep.subr.bf16.mxu0 %v1884_v0  ;;  %v1370_v11 = vpack.c.bf16 %v633_v9, %v632_v8  ;;  %v617_v13 = vld [vmem:[#allocation12 + $0x28] sm:$0xff]  ;;  %v635_v15 = vld [vmem:[#allocation12 + $0xb8] sm:$0xff]  ;;  %v618_v18 = vld [vmem:[#allocation12 + $0x30] sm:$0xff] }
  0xfc   : > { %1350 = vmatprep.subr.bf16.mxu1 %v1884_v0  ;;  %v1372_v16 = vpack.c.bf16 %v617_v13, %v616_v12  ;;  %v1374_v17 = vpack.c.bf16 %v635_v15, %v634_v14  ;;  %v619_v19 = vld [vmem:[#allocation12 + $0x38] sm:$0xff]  ;;  %v636_v20 = vld [vmem:[#allocation12 + $0xc0] sm:$0xff]  ;;  %v637_v21 = vld [vmem:[#allocation12 + $0xc8] sm:$0xff] }
  0xfd   : > { %v1376_v22 = vpack.c.bf16 %v619_v19, %v618_v18  ;;  %v1378_v23 = vpack.c.bf16 %v637_v21, %v636_v20  ;;  %v620_v24 = vld [vmem:[#allocation12 + $0x40] sm:$0xff]  ;;  %v621_v25 = vld [vmem:[#allocation12 + $0x48] sm:$0xff]  ;;  %v638_v26 = vld [vmem:[#allocation12 + $0xd0] sm:$0xff] }
  0xfe   : > { %1328 = vmatpush3.bf16.msra.mxu0 %v1327_v30  ;;  %v639_v27 = vld [vmem:[#allocation12 + $0xd8] sm:$0xff]  ;;  %v1380_v28 = vpack.c.bf16 %v621_v25, %v620_v24  ;;  %v622_v30 = vld [vmem:[#allocation12 + $0x50] sm:$0xff]  ;;  %v640_v32 = vld [vmem:[#allocation12 + $0xe0] sm:$0xff] }
  0xff   : > { %1352 = vmatpush3.bf16.msra.mxu1 %v1351_v31  ;;  %1329 = vmatprep.subr.bf16.mxu0 %v1884_v0  ;;  %v1382_v29 = vpack.c.bf16 %v639_v27, %v638_v26  ;;  %v623_v31 = vld [vmem:[#allocation12 + $0x58] sm:$0xff]  ;;  %v641_v33 = vld [vmem:[#allocation12 + $0xe8] sm:$0xff]  ;;  %v642_v39 = vld [vmem:[#allocation12 + $0xf0] sm:$0xff] }
 0x100   : > { %1353 = vmatprep.subr.bf16.mxu1 %v1884_v0  ;;  %v1384_v34 = vpack.c.bf16 %v623_v31, %v622_v30  ;;  %v1386_v35 = vpack.c.bf16 %v641_v33, %v640_v32  ;;  %v625_v37 = vld [vmem:[#allocation12 + $0x68] sm:$0xff]  ;;  %v643_v40 = vld [vmem:[#allocation12 + $0xf8] sm:$0xff]  ;;  %v626_v42 = vld [vmem:[#allocation12 + $0x70] sm:$0xff] }
 0x101   : > { %v1390_v41 = vpack.c.bf16 %v643_v40, %v642_v39  ;;  %v627_v43 = vld [vmem:[#allocation12 + $0x78] sm:$0xff]  ;;  %v718_v46 = vld [vmem:[#allocation14 + $0x8] sm:$0xff]  ;;  %v721_v51 = vld [vmem:[#allocation14 + $0x20] sm:$0xff] }
 0x102   : > { %1331 = vmatpush3.bf16.msra.mxu0 %v1330_v36  ;;  %v624_v36 = vld [vmem:[#allocation12 + $0x60] sm:$0xff]  ;;  %v1392_v44 = vpack.c.bf16 %v627_v43, %v626_v42  ;;  %v720_v49 = vld [vmem:[#allocation14 + $0x18] sm:$0xff]  ;;  %v722_v52 = vld [vmem:[#allocation14 + $0x28] sm:$0xff] }
 0x103   : > { %1355 = vmatpush3.bf16.msra.mxu1 %v1354_v38  ;;  %1332 = vmatprep.subr.bf16.mxu0 %v1884_v0  ;;  %v1388_v38 = vpack.c.bf16 %v625_v37, %v624_v36  ;;  %v1401_v53 = vpack.c.bf16 %v722_v52, %v721_v51  ;;  %v723_v54 = vld [vmem:[#allocation14 + $0x30] sm:$0xff]  ;;  %v726_v58 = vld [vmem:[#allocation14 + $0x48] sm:$0xff]  ;;  %v728_v61 = vld [vmem:[#allocation14 + $0x58] sm:$0xff] }
 0x104   : > { %1356 = vmatprep.subr.bf16.mxu1 %v1884_v0  ;;  %v727_v60 = vld [vmem:[#allocation14 + $0x50] sm:$0xff]  ;;  %v729_v9 = vld [vmem:[#allocation14 + $0x60] sm:$0xff]  ;;  %v732_v13 = vld [vmem:[#allocation14 + $0x78] sm:$0xff] }
 0x105   : > { %v1410_v62 = vpack.c.bf16 %v728_v61, %v727_v60  ;;  %v731_v12 = vld [vmem:[#allocation14 + $0x70] sm:$0xff]  ;;  %v806_v15 = vld [vmem:[#allocation15] sm:$0xff]  ;;  %v809_v19 = vld [vmem:[#allocation15 + $0x18] sm:$0xff] }
 0x106   : > { %1334 = vmatpush3.bf16.msra.mxu0 %v1333_v45  ;;  %v717_v45 = vld [vmem:[#allocation14] sm:$0xff]  ;;  %v1416_v14 = vpack.c.bf16 %v732_v13, %v731_v12  ;;  %v811_v21 = vld [vmem:[#allocation15 + $0x28] sm:$0xff]  ;;  %v813_v24 = vld [vmem:[#allocation15 + $0x38] sm:$0xff] }
 0x107   : > { %1358 = vmatpush3.bf16.msra.mxu1 %v1357_v47  ;;  %1335 = vmatprep.subr.bf16.mxu0 %v1884_v0  ;;  %v719_v47 = vld [vmem:[#allocation14 + $0x10] sm:$0xff]  ;;  %v1395_v48 = vpack.c.bf16 %v718_v46, %v717_v45  ;;  %v814_v26 = vld [vmem:[#allocation15 + $0x40] sm:$0xff]  ;;  %v815_v27 = vld [vmem:[#allocation15 + $0x48] sm:$0xff] }
 0x108   : > { %1359 = vmatprep.subr.bf16.mxu1 %v1884_v0  ;;  %v1398_v50 = vpack.c.bf16 %v720_v49, %v719_v47  ;;  %v817_v30 = vld [vmem:[#allocation15 + $0x58] sm:$0xff]  ;;  %v818_v32 = vld [vmem:[#allocation15 + $0x60] sm:$0xff]  ;;  %v819_v33 = vld [vmem:[#allocation15 + $0x68] sm:$0xff] }
 0x109   : > { %v820_v40 = vld [vmem:[#allocation15 + $0x70] sm:$0xff] }
 0x10a   : > { %1337 = vmatpush3.bf16.msra.mxu0 %v1336_v55  ;;  %v724_v55 = vld [vmem:[#allocation14 + $0x38] sm:$0xff] }
 0x10b   : > { %1361 = vmatpush3.bf16.msra.mxu1 %v1360_v57  ;;  %1363 = vmatprep.subr.bf16.mxu0 %v1362_v59  ;;  %v1404_v56 = vpack.c.bf16 %v724_v55, %v723_v54  ;;  %v725_v57 = vld [vmem:[#allocation14 + $0x40] sm:$0xff] }
 0x10c   : > { %1394 = vmatprep.subr.bf16.mxu1 %v1884_v0  ;;  %v1407_v59 = vpack.c.bf16 %v726_v58, %v725_v57 }
 0x10d   : > { %1207 = vmatmul.mubr.f32.vlgmr.msra.gmra.mrb[0].mxu0 %v424_v2 }
 0x10e   : > { %1242 = vmatmul.mubr.f32.vlgmr.msra.gmra.mrb[0].mxu1 %v429_v4  ;;  %1365 = vmatpush3.bf16.msra.mxu0 %v1364_v3 }
 0x10f   : > { %1367 = vmatprep.subr.bf16.mxu0 %v1366_v5  ;;  %1276 = vmatprep.mubr.msk.f32.mxu1 %vm1885_vm0, %v1886_v1 }
 0x110   : > { %1396 = vmatpush3.bf16.msra.mxu1 %v1395_v48 }
 0x111   : > { %1397 = vmatprep.subr.bf16.mxu1 %v1884_v0 }
 0x112   : > { %1369 = vmatpush3.bf16.msra.mxu0 %v1368_v10  ;;  %v730_v10 = vld [vmem:[#allocation14 + $0x68] sm:$0xff] }
 0x113   : > { %1371 = vmatprep.subr.bf16.mxu0 %v1370_v11  ;;  %v1413_v11 = vpack.c.bf16 %v730_v10, %v729_v9 }
 0x114   : > { %1399 = vmatpush3.bf16.msra.mxu1 %v1398_v50 }
 0x115   : > { %1400 = vmatprep.subr.bf16.mxu1 %v1884_v0 }
 0x116   : > { %1373 = vmatpush3.bf16.msra.mxu0 %v1372_v16  ;;  %v807_v16 = vld [vmem:[#allocation15 + $0x8] sm:$0xff] }
 0x117   : > { %1375 = vmatprep.subr.bf16.mxu0 %v1374_v17  ;;  %v808_v17 = vld [vmem:[#allocation15 + $0x10] sm:$0xff]  ;;  %v1419_v18 = vpack.c.bf16 %v807_v16, %v806_v15 }
 0x118   : > { %1402 = vmatpush3.bf16.msra.mxu1 %v1401_v53  ;;  %v1422_v20 = vpack.c.bf16 %v809_v19, %v808_v17 }
 0x119   : > { %1403 = vmatprep.subr.bf16.mxu1 %v1884_v0 }
 0x11a   : > { %1377 = vmatpush3.bf16.msra.mxu0 %v1376_v22 }
 0x11b   : > { %1379 = vmatprep.subr.bf16.mxu0 %v1378_v23  ;;  %v812_v23 = vld [vmem:[#allocation15 + $0x30] sm:$0xff] }
 0x11c   : > { %1405 = vmatpush3.bf16.msra.mxu1 %v1404_v56  ;;  %v1428_v25 = vpack.c.bf16 %v813_v24, %v812_v23 }
 0x11d   : > { %1406 = vmatprep.subr.bf16.mxu1 %v1884_v0 }
 0x11e   : > { %1381 = vmatpush3.bf16.msra.mxu0 %v1380_v28  ;;  %v1431_v28 = vpack.c.bf16 %v815_v27, %v814_v26 }
 0x11f   : > { %1383 = vmatprep.subr.bf16.mxu0 %v1382_v29  ;;  %v816_v29 = vld [vmem:[#allocation15 + $0x50] sm:$0xff] }
 0x120   : > { %1408 = vmatpush3.bf16.msra.mxu1 %v1407_v59  ;;  %v1434_v31 = vpack.c.bf16 %v817_v30, %v816_v29 }
 0x121   : > { %1409 = vmatprep.subr.bf16.mxu1 %v1884_v0 }
 0x122   : > { %1385 = vmatpush3.bf16.msra.mxu0 %v1384_v34  ;;  %v1437_v34 = vpack.c.bf16 %v819_v33, %v818_v32 }
 0x123   : > { %1387 = vmatprep.subr.bf16.mxu0 %v1386_v35 }
 0x124   : > { %1411 = vmatpush3.bf16.msra.mxu1 %v1410_v62 }
 0x125   : > { %1412 = vmatprep.subr.bf16.mxu1 %v1884_v0 }
 0x126   : > { %1389 = vmatpush3.bf16.msra.mxu0 %v1388_v38 }
 0x127   : > { %1391 = vmatprep.subr.bf16.mxu0 %v1390_v41  ;;  %v821_v41 = vld [vmem:[#allocation15 + $0x78] sm:$0xff] }
 0x128   : > { %1414 = vmatpush3.bf16.msra.mxu1 %v1413_v11  ;;  %v1440_v42 = vpack.c.bf16 %v821_v41, %v820_v40 }
 0x129   : > { %1415 = vmatprep.subr.bf16.mxu1 %v1884_v0 }
 0x12a   : > { %1393 = vmatpush3.bf16.msra.mxu0 %v1392_v44 }
 0x12b   : > { %1418 = vmatprep.subr.bf16.mxu0 %v1884_v0 }
 0x12c   : > { %1417 = vmatpush3.bf16.msra.mxu1 %v1416_v14 }
 0x1e0   : > { %v512_v63 = vpop.f32.mrb[0].mxu0 }
 0x1e1   : > { %vm516_vm3 = vcmp.gt.f32.partialorder %v512_v63, 0.0  ;;  %v517_v2 = vmul.f32 0.01, %v512_v63  ;;  %v601_v3 = vpop.f32.mrb[0].mxu1  ;;  %v1208_v4 = vpop.f32.mrb[1].mxu0 }
 0x1e2   : > { %vm605_vm4 = vcmp.gt.f32.partialorder %v601_v3, 0.0  ;;  %v606_v5 = vmul.f32 0.01, %v601_v3  ;;  %v1243_v6 = vpop.f32.mrb[1].mxu1 }
 0x1e3   : > { %v518_v7 = vsel %vm516_vm3, %v512_v63, %v517_v2 }
 0x1e4   : > { %v607_v8 = vsel %vm605_vm4, %v601_v3, %v606_v5 }
 0x1e5   : > { %708 = vmatprep.mubr.f32.mxu0 %v607_v8 }
 0x1e6   : > { %709 = vmatmul.mubr.f32.vlgmr.msra.gmra.mrb[2].mxu0 %v518_v7 }
 0x1e7   : > { %1311 = vmatprep.mubr.msk.f32.mxu0 %vm1885_vm0, %v1886_v1  ;;  %1420 = vmatpush3.bf16.msra.mxu0 %v1419_v18  ;;  %v810_v1 = vld [vmem:[#allocation15 + $0x20] sm:$0xff] }
 0x1e8   : > { %1421 = vmatprep.subr.bf16.mxu0 %v1884_v0  ;;  %v1425_v22 = vpack.c.bf16 %v811_v21, %v810_v1 }
 0x1eb   : > { %1423 = vmatpush3.bf16.msra.mxu0 %v1422_v20 }
 0x1ec   : > { %1424 = vmatprep.subr.bf16.mxu0 %v1884_v0 }
 0x1ef   : > { %1426 = vmatpush3.bf16.msra.mxu0 %v1425_v22 }
 0x1f0   : > { %1427 = vmatprep.subr.bf16.mxu0 %v1884_v0 }
 0x1f3   : > { %1429 = vmatpush3.bf16.msra.mxu0 %v1428_v25 }
 0x1f4   : > { %1430 = vmatprep.subr.bf16.mxu0 %v1884_v0 }
 0x1f7   : > { %1432 = vmatpush3.bf16.msra.mxu0 %v1431_v28 }
 0x1f8   : > { %1433 = vmatprep.subr.bf16.mxu0 %v1884_v0 }
 0x1fb   : > { %1435 = vmatpush3.bf16.msra.mxu0 %v1434_v31 }
 0x1fc   : > { %1436 = vmatprep.subr.bf16.mxu0 %v1884_v0 }
 0x1ff   : > { %1438 = vmatpush3.bf16.msra.mxu0 %v1437_v34 }
 0x200   : > { %1439 = vmatprep.subr.bf16.mxu0 %v1884_v0 }
 0x203   : > { %1441 = vmatpush3.bf16.msra.mxu0 %v1440_v42 }
 0x2b9   : > { %v1137_v35 = vpop.f32.mrb[2].mxu0 }
 0x2ba   : > { %v1138_v36 = vpop.f32.mrb[3].mxu0 }
 0x2bb   : > { %v1139_v37 = vadd.f32 %v1138_v36, %v1137_v35 }
 0x2bd   : > { %vm714_vm5 = vcmp.gt.f32.partialorder %v1139_v37, 0.0  ;;  %v715_v38 = vmul.f32 0.01, %v1139_v37 }
 0x2bf   : > { %v716_v39 = vsel %vm714_vm5, %v1139_v37, %v715_v38 }
 0x2c0   : > { %1277 = vmatmul.mubr.f32.vlgmr.msra.gmra.mrb[2].mxu1 %v716_v39 }
 0x393   : > { %v799_v43 = vpop.f32.mrb[2].mxu1 }
 0x394   : > { %vm803_vm6 = vcmp.gt.f32.partialorder %v799_v43, 0.0  ;;  %v804_v44 = vmul.f32 0.01, %v799_v43  ;;  %v1278_v45 = vpop.f32.mrb[3].mxu1 }
 0x396   : > { %v805_v0 = vsel %vm803_vm6, %v799_v43, %v804_v44 }
 0x397   : > { %1312 = vmatmul.mubr.f32.vlgmr.msra.gmra.mrb[4].mxu0 %v805_v0 }
 0x46a   : > { %v888_v46 = vpop.f32.mrb[4].mxu0 }
 0x46b   : > { %v892_v47 = vmax.f32 %v888_v46, 0.0  ;;  %v1313_v48 = vpop.f32.mrb[5].mxu0 }
 0x46d   : > { %893 = vst [vmem:[%s418_s20] sm:$0xff] %v892_v47 }
 0x46e   : > { %1803 = shalt.err (!%p1800_p0)
}
 0x46f   : > { %s1804_s17 = scalar_lea.hbm %s2280_s15, 128  ;;  %s1808_s14 = scalar_lea.hbm %s2332_s8, 256 }
 0x470   : > { %p1805_p2 = scmp.ne.s32.totalorder %s2280_s15, %s1804_s17  ;;  %p1809_p12 = scmp.lt.u32.totalorder %s2280_s15, %s2332_s8 }
 0x471   : > { %p1810_p11 = scmp.lt.u32.totalorder %s1808_s14, %s1804_s17  ;;  %p1812_p5 = scmp.lt.u32.totalorder %s1804_s17, %s2280_s15 }
 0x472   : > { %p1806_p8 = pnand %p1805_p2, %p2355_p7 }
 0x473   : > { %p1811_p13 = por %p1810_p11, %p1809_p12 }
 0x474   : > { %p1807_p10 = pneg %p1806_p8 }
 0x475   : > { %p1813_p4 = por %p1812_p5, %p1811_p13 }
 0x477   : > { %p1814_p1 = pnand %p1813_p4, %p1807_p10 }
 0x479   : > { %1817 = shalt.err (!%p1814_p1)
}
 0x47a   : > { %1472 = dma.vmem_to_hbm [thread:$0]  (%p2355_p7), %s2282_s10, 128, %s2280_s15, %s895_s26  }
 0x47b PF: > { %s920_s13 = sand.u32 1, %s1860_s27   ;;  %p2356_p3 = scmp.ne.s32.totalorder %s2344_s18, 0 }
 0x47c   : > { %p2357_p9 = scmp.ge.s32.totalorder %s1872_s30, 2  ;;  %s921_s19 = scalar_lea.sflag [#allocation5], %s920_s13 }
 0x47e   : > { %p1501_p6 = pnand %p2357_p9, %p2356_p3 }
 0x480   : > { %1855 = dma.done.wait (!%p1501_p6), %s921_s19, 128  }
 0x481   : > { %1857 = vsyncadd (!%p1501_p6), %s921_s19, 4294967168  ;;  %p25_p0 = scmp.ge.s32.totalorder %s2135_s23, 4   ;;  %s2358_s27 = smov %s1864_s28 }
 0x482   : > { %s2359_s28 = smov %s1868_s29  ;;  %s2360_s29 = smov %s2147_s1 }
 0x483   : > { %s2361_s30 = smov %s2135_s23  ;;  %27 = sbr.rel (!%p25_p0) target bundleno = 11 (0xb), region = 125 }
 0x48a   :  { %926 = vsyncpa [#allocation4], 1 }
 0x48b   :  { %928 = vsyncpa [#allocation4 + $0x1], 1 }
 0x48c   :  { %929 = vsyncpa [#allocation7], 1 }
 0x48d   :  { %930 = vsyncpa [#allocation10], 1 }
 0x48e   :  { %931 = vsyncpa [#allocation13], 1 }
 0x48f   :  { %932 = vsyncpa [#allocation16], 1 }
 0x490   :  { %933 = vsyncpa [#allocation5], 1 }
 0x491   :  { %935 = vsyncpa [#allocation5 + $0x1], 1 }

</bundles_post_ra>
